<compile_context>
chip_gen: v7x
topology: tpu7x:2x2x1
jax: 0.10.0
libtpu: 0.0.40
codegen_flags: <defaults>
</compile_context>

<pallas_src>
import numpy as np
import jax
import jax.numpy as jnp
from jax.experimental import pallas as pl
from jax.experimental.pallas import tpu as pltpu


_DILATIONS = (1, 2, 3)


def _make_kernel(H, W, C, CO, CR, B_TILE, dilations=_DILATIONS):
    HW = H * W

    def kernel(x_ref, masks_ref, wconv_ref, finpk_ref, wcha_ref,
               b1_ref, bf_ref, bfin_ref, out_ref, y_ref):
        # x_ref:     (B_TILE, C, HW) f32   lane-dense images of this batch tile
        # masks_ref: (27, HW)        f32   per-(branch,tap) OOB masks, loop order
        # wconv_ref: (27, CO, C)     bf16  BN-folded per-tap conv weights, loop order
        # finpk_ref: (2, 3, CO, 1)   f32   [0]=BN-folded conv bias, [1]=final 1x1 weights
        # wcha_ref:  (3, C, CR)      f32   [0]=W_max^T, [1]=W_avg^T, [2]=W_final
        # b1_ref:    (2, 1, CR)      f32   FC1 biases (max path, avg path)
        # bf_ref:    (C, 1)          f32   final_fc bias
        # bfin_ref:  (1, 1)          f32   final 1x1 conv bias

        def process_image(i):
            xc = x_ref[i]                                            # (C, HW) f32

            # ---- channel attention: max/avg pool -> FC+ReLU (x2) -> FC -> sigmoid
            #      (VPU broadcast-FMAs + XLU reduces only; no MXU, no N-widening)
            p_max = jnp.max(xc, axis=1, keepdims=True)               # (C, 1)
            p_avg = jnp.sum(xc, axis=1, keepdims=True) * (1.0 / HW)  # (C, 1)
            hm = jnp.maximum(
                jnp.sum(wcha_ref[0] * p_max, axis=0, keepdims=True) + b1_ref[0], 0.0)
            ha = jnp.maximum(
                jnp.sum(wcha_ref[1] * p_avg, axis=0, keepdims=True) + b1_ref[1], 0.0)
            h = hm + ha                                              # (1, CR)
            ycol = jax.nn.sigmoid(
                jnp.sum(wcha_ref[2] * h, axis=1, keepdims=True) + bf_ref[...])  # (C, 1)
            y_ref[i] = ycol

            # ---- spatial attention: 3 dilated 3x3 convs (BN folded, ReLU),
            #      1x1 conv over concatenated channels, sigmoid.
            #      Per tap:  roll(dot(W_tap, x), -shift) masked at image edges.
            xb = xc.astype(jnp.bfloat16)                             # MXU operand
            zfin = jnp.zeros((1, HW), jnp.float32) + bfin_ref[...]   # (1, HW)
            for bi, d in enumerate(dilations):                       # static: 3 branches
                acc = jnp.zeros((CO, HW), jnp.float32) + finpk_ref[0, bi]
                for ky in range(3):                                  # static: 9 taps
                    for kx in range(3):
                        ti = bi * 9 + ky * 3 + kx
                        t = jnp.dot(wconv_ref[ti], xb,
                                    preferred_element_type=jnp.float32)  # (CO, HW)
                        s = (ky - 1) * d * W + (kx - 1) * d
                        if s != 0:
                            # out[:, p] needs t[:, p + s]; circular wrap is killed
                            # by the OOB mask (f32 multiply -> v5e-safe).
                            t = pltpu.roll(t, shift=(-s) % HW, axis=1)
                            t = t * masks_ref[ti:ti + 1, :]
                        acc = acc + t
                acc = jnp.maximum(acc, 0.0)                          # BN(eval) folded + ReLU
                # final 1x1 conv contribution == weighted sum of acc rows (VPU + XLU)
                zfin = zfin + jnp.sum(acc * finpk_ref[1, bi], axis=0, keepdims=True)
            z = jax.nn.sigmoid(zfin)                                 # (1, HW)

            out_ref[i] = xc * (ycol * z)                             # lane-dense store

        if B_TILE == 1:
            process_image(0)
        else:
            @pl.loop(0, B_TILE)
            def _(i):
                process_image(i)

    return kernel


def _build_masks(H, W, dilations=_DILATIONS):
    """(27, HW) f32 masks: 1 where the tap's source pixel is inside the image."""
    HW = H * W
    hh, ww = np.meshgrid(np.arange(H), np.arange(W), indexing="ij")
    rows = []
    for d in dilations:
        for ky in range(3):
            for kx in range(3):
                dy, dx = (ky - 1) * d, (kx - 1) * d
                ok = ((hh + dy >= 0) & (hh + dy < H) &
                      (ww + dx >= 0) & (ww + dx < W))
                rows.append(ok.reshape(HW).astype(np.float32))
    return np.stack(rows, axis=0)


def _choose_tiling(B):
    """(num_programs, images per program).  Keep >=2 programs when B>=2 so both
    v7x TensorCores get work; batch the rest of the images into each step to
    amortize per-grid-step overhead.  Cap the tile so double-buffered x/out
    blocks stay tiny relative to every generation's VMEM."""
    if B <= 1:
        return 1, 1
    max_tile = 32
    num = max(2, -(-B // max_tile))
    return num, -(-B // num)


def attention_part_forward(x_nchw, params):
    """Equivalent of AttentionPart.forward. Returns (x*y*z [NCHW], y [B,C,1,1])."""
    B, C, H, W = x_nchw.shape
    HW = H * W
    assert HW % 128 == 0, "kernel assumes a lane-dense H*W axis (multiple of 128)"
    CO = params["wconv"].shape[1]
    CR = params["wcha"].shape[2]

    x = x_nchw.astype(jnp.float32).reshape(B, C, HW)     # free reshape: no transpose/pad
    num_tiles, bt = _choose_tiling(B)
    b_pad = num_tiles * bt
    if b_pad != B:
        x = jnp.concatenate([x, jnp.zeros((b_pad - B, C, HW), jnp.float32)], axis=0)

    masks = jnp.asarray(_build_masks(H, W))              # (27, HW) f32

    kernel = _make_kernel(H, W, C, CO, CR, bt)

    def const_spec(a):
        zeros = (0,) * a.ndim
        return pl.BlockSpec(a.shape, lambda b, _z=zeros: _z)

    consts = [masks, params["wconv"], params["finpk"], params["wcha"],
              params["b1"], params["bf"], params["bfin"]]

    out_flat, y = pl.pallas_call(
        kernel,
        out_shape=(jax.ShapeDtypeStruct((b_pad, C, HW), jnp.float32),
                   jax.ShapeDtypeStruct((b_pad, C, 1), jnp.float32)),
        grid=(num_tiles,),
        in_specs=[pl.BlockSpec((bt, C, HW), lambda b: (b, 0, 0))]
                 + [const_spec(a) for a in consts],
        out_specs=(pl.BlockSpec((bt, C, HW), lambda b: (b, 0, 0)),
                   pl.BlockSpec((bt, C, 1), lambda b: (b, 0, 0))),
        compiler_params=pltpu.CompilerParams(
            # "parallel" lets megacore shard the batch-tile axis; portable across
            # v5e/v6e/v7x (CORE_PARALLEL is a v7x-only knob worth sweeping later).
            dimension_semantics=("parallel",),
            vmem_limit_bytes=32 * 1024 * 1024),
    )(x, *consts)

    out = out_flat[:B].reshape(B, C, H, W)               # free reshape back to NCHW
    y_out = y[:B].reshape(B, C, 1, 1)
    return out, y_out


def init_params(key, channel, reduction=16):
    """Deterministic xavier-normal weights, zero biases (matches param_init)."""
    C, CR, CO = channel, channel // reduction, channel // 8
    keys = jax.random.split(key, 7)

    def xavier(k, shape, fan_in, fan_out):
        std = (2.0 / (fan_in + fan_out)) ** 0.5
        return std * jax.random.normal(k, shape, jnp.float32)

    # Channel-attention FCs (PyTorch Linear weights are (out, in)).
    w_max = xavier(keys[0], (CR, C), C, CR)              # max_fc
    w_avg = xavier(keys[1], (CR, C), C, CR)              # avg_fc
    w_fc = xavier(keys[2], (C, CR), CR, C)               # final_fc
    wcha = jnp.stack([w_max.T, w_avg.T, w_fc], axis=0)   # (3, C, CR)
    b1 = jnp.zeros((2, 1, CR), jnp.float32)
    bf = jnp.zeros((C, 1), jnp.float32)

    # Dilated 3x3 convs; BN (eval mode, default running stats) folded in:
    #   scale = gamma / sqrt(var + eps) = 1/sqrt(1 + 1e-5); shift = 0; conv bias = 0.
    eps = 1e-5
    bn_scale = 1.0 / jnp.sqrt(jnp.float32(1.0 + eps))
    taps = []
    for i in range(3):
        w = xavier(keys[3 + i], (CO, C, 3, 3), C * 9, CO * 9)      # PyTorch conv layout
        taps.append((w * bn_scale).transpose(2, 3, 0, 1).reshape(9, CO, C))
    wconv = jnp.concatenate(taps, axis=0).astype(jnp.bfloat16)     # (27, CO, C)
    bconv = jnp.zeros((3, CO, 1), jnp.float32)                     # BN-folded bias (0 here)

    w_final_conv = xavier(keys[6], (1, 3 * CO, 1, 1), 3 * CO, 1)   # 1x1 final conv
    wfin = w_final_conv.reshape(3, CO, 1)                          # per-branch columns
    finpk = jnp.stack([bconv, wfin], axis=0)                       # (2, 3, CO, 1)
    bfin = jnp.zeros((1, 1), jnp.float32)

    return dict(wcha=wcha, b1=b1, bf=bf, wconv=wconv, finpk=finpk, bfin=bfin)


if __name__ == "__main__":
    key = jax.random.PRNGKey(0)
    kx, kp = jax.random.split(key)
    C = 32                      # divisible by reduction=16 and by 8
    x = jax.random.normal(kx, (2, C, 16, 16), jnp.float32)
    params = init_params(kp, C, reduction=16)

    out, y = jax.jit(attention_part_forward)(x, params)
    jax.block_until_ready((out, y))
    assert out.shape == (2, C, 16, 16)
    assert y.shape == (2, C, 1, 1)
    assert bool(jnp.all(jnp.isfinite(out))) and bool(jnp.all(jnp.isfinite(y)))
    print("KERNEL_OK")
</pallas_src>

<mosaic_0001>
module attributes {stable_mosaic.version = 11 : i64} {
  func.func @kernel(%arg0: i32, %arg1: memref<1x32x256xf32, #tpu.memory_space<vmem>>, %arg2: memref<27x256xf32, #tpu.memory_space<vmem>>, %arg3: memref<27x4x32xbf16, #tpu.memory_space<vmem>>, %arg4: memref<2x3x4x1xf32, #tpu.memory_space<vmem>>, %arg5: memref<3x32x2xf32, #tpu.memory_space<vmem>>, %arg6: memref<2x1x2xf32, #tpu.memory_space<vmem>>, %arg7: memref<32x1xf32, #tpu.memory_space<vmem>>, %arg8: memref<1x1xf32, #tpu.memory_space<vmem>>, %arg9: memref<1x32x256xf32, #tpu.memory_space<vmem>>, %arg10: memref<1x32x1xf32, #tpu.memory_space<vmem>>) attributes {dimension_semantics = [#tpu.dimension_semantics<parallel>], iteration_bounds = array<i64: 2>, scalar_prefetch = 0 : i64, scratch_operands = 0 : i64, tpu.core_type = #tpu.core_type<tc>, window_params = [{transform_indices = @transform_0, window_bounds = array<i64: 1, 32, 256>}, {pipeline_mode = #tpu.pipeline_mode<synchronous>, transform_indices = @transform_1, window_bounds = array<i64: 27, 256>}, {pipeline_mode = #tpu.pipeline_mode<synchronous>, transform_indices = @transform_2, window_bounds = array<i64: 27, 4, 32>}, {pipeline_mode = #tpu.pipeline_mode<synchronous>, transform_indices = @transform_3, window_bounds = array<i64: 2, 3, 4, 1>}, {pipeline_mode = #tpu.pipeline_mode<synchronous>, transform_indices = @transform_4, window_bounds = array<i64: 3, 32, 2>}, {pipeline_mode = #tpu.pipeline_mode<synchronous>, transform_indices = @transform_5, window_bounds = array<i64: 2, 1, 2>}, {pipeline_mode = #tpu.pipeline_mode<synchronous>, transform_indices = @transform_6, window_bounds = array<i64: 32, 1>}, {pipeline_mode = #tpu.pipeline_mode<synchronous>, transform_indices = @transform_7, window_bounds = array<i64: 1, 1>}, {transform_indices = @transform_8, window_bounds = array<i64: 1, 32, 256>}, {transform_indices = @transform_9, window_bounds = array<i64: 1, 32, 1>}]} {
    %c0 = arith.constant 0 : index
    %c0_0 = arith.constant 0 : index
    %c0_1 = arith.constant 0 : index
    %0 = vector.load %arg1[%c0, %c0_0, %c0_1] : memref<1x32x256xf32, #tpu.memory_space<vmem>>, vector<1x32x256xf32>
    %1 = vector.shape_cast %0 : vector<1x32x256xf32> to vector<32x256xf32>
    %cst = arith.constant dense<0xFF800000> : vector<32xf32>
    %2 = vector.multi_reduction <maximumf>, %1, %cst [1] : vector<32x256xf32> to vector<32xf32>
    %3 = vector.shape_cast %2 : vector<32xf32> to vector<32x1xf32>
    %cst_2 = arith.constant dense<0.000000e+00> : vector<32xf32>
    %4 = vector.multi_reduction <add>, %1, %cst_2 [1] : vector<32x256xf32> to vector<32xf32>
    %5 = vector.shape_cast %4 : vector<32xf32> to vector<32x1xf32>
    %cst_3 = arith.constant 3.906250e-03 : f32
    %6 = vector.broadcast %cst_3 : f32 to vector<32x1xf32>
    %7 = arith.mulf %5, %6 : vector<32x1xf32>
    %c0_4 = arith.constant 0 : index
    %c0_5 = arith.constant 0 : index
    %c0_6 = arith.constant 0 : index
    %8 = vector.load %arg5[%c0_4, %c0_5, %c0_6] : memref<3x32x2xf32, #tpu.memory_space<vmem>>, vector<1x32x2xf32>
    %9 = vector.shape_cast %8 : vector<1x32x2xf32> to vector<32x2xf32>
    %10 = vector.broadcast %3 : vector<32x1xf32> to vector<32x2xf32>
    %11 = arith.mulf %9, %10 : vector<32x2xf32>
    %cst_7 = arith.constant dense<0.000000e+00> : vector<2xf32>
    %12 = vector.multi_reduction <add>, %11, %cst_7 [0] : vector<32x2xf32> to vector<2xf32>
    %13 = vector.shape_cast %12 : vector<2xf32> to vector<1x2xf32>
    %c0_8 = arith.constant 0 : index
    %c0_9 = arith.constant 0 : index
    %c0_10 = arith.constant 0 : index
    %14 = vector.load %arg6[%c0_8, %c0_9, %c0_10] : memref<2x1x2xf32, #tpu.memory_space<vmem>>, vector<1x1x2xf32>
    %15 = vector.shape_cast %14 : vector<1x1x2xf32> to vector<1x2xf32>
    %16 = arith.addf %13, %15 : vector<1x2xf32>
    %cst_11 = arith.constant 0.000000e+00 : f32
    %17 = vector.broadcast %cst_11 : f32 to vector<1x2xf32>
    %18 = arith.maximumf %16, %17 : vector<1x2xf32>
    %c1 = arith.constant 1 : index
    %c0_12 = arith.constant 0 : index
    %c0_13 = arith.constant 0 : index
    %19 = vector.load %arg5[%c1, %c0_12, %c0_13] : memref<3x32x2xf32, #tpu.memory_space<vmem>>, vector<1x32x2xf32>
    %20 = vector.shape_cast %19 : vector<1x32x2xf32> to vector<32x2xf32>
    %21 = vector.broadcast %7 : vector<32x1xf32> to vector<32x2xf32>
    %22 = arith.mulf %20, %21 : vector<32x2xf32>
    %cst_14 = arith.constant dense<0.000000e+00> : vector<2xf32>
    %23 = vector.multi_reduction <add>, %22, %cst_14 [0] : vector<32x2xf32> to vector<2xf32>
    %24 = vector.shape_cast %23 : vector<2xf32> to vector<1x2xf32>
    %c1_15 = arith.constant 1 : index
    %c0_16 = arith.constant 0 : index
    %c0_17 = arith.constant 0 : index
    %25 = vector.load %arg6[%c1_15, %c0_16, %c0_17] : memref<2x1x2xf32, #tpu.memory_space<vmem>>, vector<1x1x2xf32>
    %26 = vector.shape_cast %25 : vector<1x1x2xf32> to vector<1x2xf32>
    %27 = arith.addf %24, %26 : vector<1x2xf32>
    %cst_18 = arith.constant 0.000000e+00 : f32
    %28 = vector.broadcast %cst_18 : f32 to vector<1x2xf32>
    %29 = arith.maximumf %27, %28 : vector<1x2xf32>
    %30 = arith.addf %18, %29 : vector<1x2xf32>
    %c2 = arith.constant 2 : index
    %c0_19 = arith.constant 0 : index
    %c0_20 = arith.constant 0 : index
    %31 = vector.load %arg5[%c2, %c0_19, %c0_20] : memref<3x32x2xf32, #tpu.memory_space<vmem>>, vector<1x32x2xf32>
    %32 = vector.shape_cast %31 : vector<1x32x2xf32> to vector<32x2xf32>
    %33 = vector.broadcast %30 : vector<1x2xf32> to vector<32x2xf32>
    %34 = arith.mulf %32, %33 : vector<32x2xf32>
    %cst_21 = arith.constant dense<0.000000e+00> : vector<32xf32>
    %35 = vector.multi_reduction <add>, %34, %cst_21 [1] : vector<32x2xf32> to vector<32xf32>
    %36 = vector.shape_cast %35 : vector<32xf32> to vector<32x1xf32>
    %c0_22 = arith.constant 0 : index
    %c0_23 = arith.constant 0 : index
    %37 = vector.load %arg7[%c0_22, %c0_23] : memref<32x1xf32, #tpu.memory_space<vmem>>, vector<32x1xf32>
    %38 = arith.addf %36, %37 : vector<32x1xf32>
    %39 = arith.negf %38 : vector<32x1xf32>
    %40 = math.exp %39 : vector<32x1xf32>
    %cst_24 = arith.constant 1.000000e+00 : f32
    %41 = vector.broadcast %cst_24 : f32 to vector<32x1xf32>
    %42 = arith.addf %41, %40 : vector<32x1xf32>
    %43 = arith.divf %41, %42 : vector<32x1xf32>
    %c0_25 = arith.constant 0 : index
    %c0_26 = arith.constant 0 : index
    %c0_27 = arith.constant 0 : index
    %44 = vector.load %arg10[%c0_25, %c0_26, %c0_27] : memref<1x32x1xf32, #tpu.memory_space<vmem>>, vector<1x32x1xf32>
    %45 = vector.shape_cast %44 : vector<1x32x1xf32> to vector<32x1xf32>
    %46 = vector.shape_cast %43 : vector<32x1xf32> to vector<1x32x1xf32>
    tpu.vector_store %arg10[%c0_25, %c0_26, %c0_27], %46 {strides = array<i32>} : memref<1x32x1xf32, #tpu.memory_space<vmem>>, vector<1x32x1xf32>,
    %47 = arith.truncf %1 : vector<32x256xf32> to vector<32x256xbf16>
    %cst_28 = arith.constant 0.000000e+00 : f32
    %48 = vector.broadcast %cst_28 : f32 to vector<1x256xf32>
    %c0_29 = arith.constant 0 : index
    %c0_30 = arith.constant 0 : index
    %49 = vector.load %arg8[%c0_29, %c0_30] : memref<1x1xf32, #tpu.memory_space<vmem>>, vector<1x1xf32>
    %50 = vector.broadcast %49 : vector<1x1xf32> to vector<1x256xf32>
    %51 = arith.addf %48, %50 : vector<1x256xf32>
    %cst_31 = arith.constant 0.000000e+00 : f32
    %52 = vector.broadcast %cst_31 : f32 to vector<4x256xf32>
    %c0_32 = arith.constant 0 : index
    %c0_33 = arith.constant 0 : index
    %c0_34 = arith.constant 0 : index
    %c0_35 = arith.constant 0 : index
    %53 = vector.load %arg4[%c0_32, %c0_33, %c0_34, %c0_35] : memref<2x3x4x1xf32, #tpu.memory_space<vmem>>, vector<1x1x4x1xf32>
    %54 = vector.shape_cast %53 : vector<1x1x4x1xf32> to vector<4x1xf32>
    %55 = vector.broadcast %54 : vector<4x1xf32> to vector<4x256xf32>
    %56 = arith.addf %52, %55 : vector<4x256xf32>
    %c0_36 = arith.constant 0 : index
    %c0_37 = arith.constant 0 : index
    %c0_38 = arith.constant 0 : index
    %57 = vector.load %arg3[%c0_36, %c0_37, %c0_38] : memref<27x4x32xbf16, #tpu.memory_space<vmem>>, vector<1x4x32xbf16>
    %58 = vector.shape_cast %57 : vector<1x4x32xbf16> to vector<4x32xbf16>
    %cst_39 = arith.constant dense<0.000000e+00> : vector<4x256xf32>
    %59 = tpu.matmul %58, %47, %cst_39 {dimension_numbers = #tpu.dot_dimension_numbers<[1], [0], [0], [1], [0, 0, 1, 1], [], []>} : vector<4x32xbf16>, vector<32x256xbf16>, vector<4x256xf32> -> vector<4x256xf32>
    %c17_i32 = arith.constant 17 : i32
    %60 = tpu.dynamic_rotate %59 by %c17_i32 dim 1 : vector<4x256xf32>, i32 -> vector<4x256xf32>
    %c0_40 = arith.constant 0 : index
    %c0_41 = arith.constant 0 : index
    %61 = vector.load %arg2[%c0_40, %c0_41] : memref<27x256xf32, #tpu.memory_space<vmem>>, vector<1x256xf32>
    %62 = vector.broadcast %61 : vector<1x256xf32> to vector<4x256xf32>
    %63 = arith.mulf %60, %62 : vector<4x256xf32>
    %64 = arith.addf %56, %63 : vector<4x256xf32>
    %c1_42 = arith.constant 1 : index
    %c0_43 = arith.constant 0 : index
    %c0_44 = arith.constant 0 : index
    %65 = vector.load %arg3[%c1_42, %c0_43, %c0_44] : memref<27x4x32xbf16, #tpu.memory_space<vmem>>, vector<1x4x32xbf16>
    %66 = vector.shape_cast %65 : vector<1x4x32xbf16> to vector<4x32xbf16>
    %cst_45 = arith.constant dense<0.000000e+00> : vector<4x256xf32>
    %67 = tpu.matmul %66, %47, %cst_45 {dimension_numbers = #tpu.dot_dimension_numbers<[1], [0], [0], [1], [0, 0, 1, 1], [], []>} : vector<4x32xbf16>, vector<32x256xbf16>, vector<4x256xf32> -> vector<4x256xf32>
    %c16_i32 = arith.constant 16 : i32
    %68 = tpu.dynamic_rotate %67 by %c16_i32 dim 1 : vector<4x256xf32>, i32 -> vector<4x256xf32>
    %c1_46 = arith.constant 1 : index
    %c0_47 = arith.constant 0 : index
    %69 = vector.load %arg2[%c1_46, %c0_47] : memref<27x256xf32, #tpu.memory_space<vmem>>, vector<1x256xf32>
    %70 = vector.broadcast %69 : vector<1x256xf32> to vector<4x256xf32>
    %71 = arith.mulf %68, %70 : vector<4x256xf32>
    %72 = arith.addf %64, %71 : vector<4x256xf32>
    %c2_48 = arith.constant 2 : index
    %c0_49 = arith.constant 0 : index
    %c0_50 = arith.constant 0 : index
    %73 = vector.load %arg3[%c2_48, %c0_49, %c0_50] : memref<27x4x32xbf16, #tpu.memory_space<vmem>>, vector<1x4x32xbf16>
    %74 = vector.shape_cast %73 : vector<1x4x32xbf16> to vector<4x32xbf16>
    %cst_51 = arith.constant dense<0.000000e+00> : vector<4x256xf32>
    %75 = tpu.matmul %74, %47, %cst_51 {dimension_numbers = #tpu.dot_dimension_numbers<[1], [0], [0], [1], [0, 0, 1, 1], [], []>} : vector<4x32xbf16>, vector<32x256xbf16>, vector<4x256xf32> -> vector<4x256xf32>
    %c15_i32 = arith.constant 15 : i32
    %76 = tpu.dynamic_rotate %75 by %c15_i32 dim 1 : vector<4x256xf32>, i32 -> vector<4x256xf32>
    %c2_52 = arith.constant 2 : index
    %c0_53 = arith.constant 0 : index
    %77 = vector.load %arg2[%c2_52, %c0_53] : memref<27x256xf32, #tpu.memory_space<vmem>>, vector<1x256xf32>
    %78 = vector.broadcast %77 : vector<1x256xf32> to vector<4x256xf32>
    %79 = arith.mulf %76, %78 : vector<4x256xf32>
    %80 = arith.addf %72, %79 : vector<4x256xf32>
    %c3 = arith.constant 3 : index
    %c0_54 = arith.constant 0 : index
    %c0_55 = arith.constant 0 : index
    %81 = vector.load %arg3[%c3, %c0_54, %c0_55] : memref<27x4x32xbf16, #tpu.memory_space<vmem>>, vector<1x4x32xbf16>
    %82 = vector.shape_cast %81 : vector<1x4x32xbf16> to vector<4x32xbf16>
    %cst_56 = arith.constant dense<0.000000e+00> : vector<4x256xf32>
    %83 = tpu.matmul %82, %47, %cst_56 {dimension_numbers = #tpu.dot_dimension_numbers<[1], [0], [0], [1], [0, 0, 1, 1], [], []>} : vector<4x32xbf16>, vector<32x256xbf16>, vector<4x256xf32> -> vector<4x256xf32>
    %c1_i32 = arith.constant 1 : i32
    %84 = tpu.dynamic_rotate %83 by %c1_i32 dim 1 : vector<4x256xf32>, i32 -> vector<4x256xf32>
    %c3_57 = arith.constant 3 : index
    %c0_58 = arith.constant 0 : index
    %85 = vector.load %arg2[%c3_57, %c0_58] : memref<27x256xf32, #tpu.memory_space<vmem>>, vector<1x256xf32>
    %86 = vector.broadcast %85 : vector<1x256xf32> to vector<4x256xf32>
    %87 = arith.mulf %84, %86 : vector<4x256xf32>
    %88 = arith.addf %80, %87 : vector<4x256xf32>
    %c4 = arith.constant 4 : index
    %c0_59 = arith.constant 0 : index
    %c0_60 = arith.constant 0 : index
    %89 = vector.load %arg3[%c4, %c0_59, %c0_60] : memref<27x4x32xbf16, #tpu.memory_space<vmem>>, vector<1x4x32xbf16>
    %90 = vector.shape_cast %89 : vector<1x4x32xbf16> to vector<4x32xbf16>
    %cst_61 = arith.constant dense<0.000000e+00> : vector<4x256xf32>
    %91 = tpu.matmul %90, %47, %cst_61 {dimension_numbers = #tpu.dot_dimension_numbers<[1], [0], [0], [1], [0, 0, 1, 1], [], []>} : vector<4x32xbf16>, vector<32x256xbf16>, vector<4x256xf32> -> vector<4x256xf32>
    %92 = arith.addf %88, %91 : vector<4x256xf32>
    %c5 = arith.constant 5 : index
    %c0_62 = arith.constant 0 : index
    %c0_63 = arith.constant 0 : index
    %93 = vector.load %arg3[%c5, %c0_62, %c0_63] : memref<27x4x32xbf16, #tpu.memory_space<vmem>>, vector<1x4x32xbf16>
    %94 = vector.shape_cast %93 : vector<1x4x32xbf16> to vector<4x32xbf16>
    %cst_64 = arith.constant dense<0.000000e+00> : vector<4x256xf32>
    %95 = tpu.matmul %94, %47, %cst_64 {dimension_numbers = #tpu.dot_dimension_numbers<[1], [0], [0], [1], [0, 0, 1, 1], [], []>} : vector<4x32xbf16>, vector<32x256xbf16>, vector<4x256xf32> -> vector<4x256xf32>
    %c255_i32 = arith.constant 255 : i32
    %96 = tpu.dynamic_rotate %95 by %c255_i32 dim 1 : vector<4x256xf32>, i32 -> vector<4x256xf32>
    %c5_65 = arith.constant 5 : index
    %c0_66 = arith.constant 0 : index
    %97 = vector.load %arg2[%c5_65, %c0_66] : memref<27x256xf32, #tpu.memory_space<vmem>>, vector<1x256xf32>
    %98 = vector.broadcast %97 : vector<1x256xf32> to vector<4x256xf32>
    %99 = arith.mulf %96, %98 : vector<4x256xf32>
    %100 = arith.addf %92, %99 : vector<4x256xf32>
    %c6 = arith.constant 6 : index
    %c0_67 = arith.constant 0 : index
    %c0_68 = arith.constant 0 : index
    %101 = vector.load %arg3[%c6, %c0_67, %c0_68] : memref<27x4x32xbf16, #tpu.memory_space<vmem>>, vector<1x4x32xbf16>
    %102 = vector.shape_cast %101 : vector<1x4x32xbf16> to vector<4x32xbf16>
    %cst_69 = arith.constant dense<0.000000e+00> : vector<4x256xf32>
    %103 = tpu.matmul %102, %47, %cst_69 {dimension_numbers = #tpu.dot_dimension_numbers<[1], [0], [0], [1], [0, 0, 1, 1], [], []>} : vector<4x32xbf16>, vector<32x256xbf16>, vector<4x256xf32> -> vector<4x256xf32>
    %c241_i32 = arith.constant 241 : i32
    %104 = tpu.dynamic_rotate %103 by %c241_i32 dim 1 : vector<4x256xf32>, i32 -> vector<4x256xf32>
    %c6_70 = arith.constant 6 : index
    %c0_71 = arith.constant 0 : index
    %105 = vector.load %arg2[%c6_70, %c0_71] : memref<27x256xf32, #tpu.memory_space<vmem>>, vector<1x256xf32>
    %106 = vector.broadcast %105 : vector<1x256xf32> to vector<4x256xf32>
    %107 = arith.mulf %104, %106 : vector<4x256xf32>
    %108 = arith.addf %100, %107 : vector<4x256xf32>
    %c7 = arith.constant 7 : index
    %c0_72 = arith.constant 0 : index
    %c0_73 = arith.constant 0 : index
    %109 = vector.load %arg3[%c7, %c0_72, %c0_73] : memref<27x4x32xbf16, #tpu.memory_space<vmem>>, vector<1x4x32xbf16>
    %110 = vector.shape_cast %109 : vector<1x4x32xbf16> to vector<4x32xbf16>
    %cst_74 = arith.constant dense<0.000000e+00> : vector<4x256xf32>
    %111 = tpu.matmul %110, %47, %cst_74 {dimension_numbers = #tpu.dot_dimension_numbers<[1], [0], [0], [1], [0, 0, 1, 1], [], []>} : vector<4x32xbf16>, vector<32x256xbf16>, vector<4x256xf32> -> vector<4x256xf32>
    %c240_i32 = arith.constant 240 : i32
    %112 = tpu.dynamic_rotate %111 by %c240_i32 dim 1 : vector<4x256xf32>, i32 -> vector<4x256xf32>
    %c7_75 = arith.constant 7 : index
    %c0_76 = arith.constant 0 : index
    %113 = vector.load %arg2[%c7_75, %c0_76] : memref<27x256xf32, #tpu.memory_space<vmem>>, vector<1x256xf32>
    %114 = vector.broadcast %113 : vector<1x256xf32> to vector<4x256xf32>
    %115 = arith.mulf %112, %114 : vector<4x256xf32>
    %116 = arith.addf %108, %115 : vector<4x256xf32>
    %c8 = arith.constant 8 : index
    %c0_77 = arith.constant 0 : index
    %c0_78 = arith.constant 0 : index
    %117 = vector.load %arg3[%c8, %c0_77, %c0_78] : memref<27x4x32xbf16, #tpu.memory_space<vmem>>, vector<1x4x32xbf16>
    %118 = vector.shape_cast %117 : vector<1x4x32xbf16> to vector<4x32xbf16>
    %cst_79 = arith.constant dense<0.000000e+00> : vector<4x256xf32>
    %119 = tpu.matmul %118, %47, %cst_79 {dimension_numbers = #tpu.dot_dimension_numbers<[1], [0], [0], [1], [0, 0, 1, 1], [], []>} : vector<4x32xbf16>, vector<32x256xbf16>, vector<4x256xf32> -> vector<4x256xf32>
    %c239_i32 = arith.constant 239 : i32
    %120 = tpu.dynamic_rotate %119 by %c239_i32 dim 1 : vector<4x256xf32>, i32 -> vector<4x256xf32>
    %c8_80 = arith.constant 8 : index
    %c0_81 = arith.constant 0 : index
    %121 = vector.load %arg2[%c8_80, %c0_81] : memref<27x256xf32, #tpu.memory_space<vmem>>, vector<1x256xf32>
    %122 = vector.broadcast %121 : vector<1x256xf32> to vector<4x256xf32>
    %123 = arith.mulf %120, %122 : vector<4x256xf32>
    %124 = arith.addf %116, %123 : vector<4x256xf32>
    %cst_82 = arith.constant 0.000000e+00 : f32
    %125 = vector.broadcast %cst_82 : f32 to vector<4x256xf32>
    %126 = arith.maximumf %124, %125 : vector<4x256xf32>
    %c1_83 = arith.constant 1 : index
    %c0_84 = arith.constant 0 : index
    %c0_85 = arith.constant 0 : index
    %c0_86 = arith.constant 0 : index
    %127 = vector.load %arg4[%c1_83, %c0_84, %c0_85, %c0_86] : memref<2x3x4x1xf32, #tpu.memory_space<vmem>>, vector<1x1x4x1xf32>
    %128 = vector.shape_cast %127 : vector<1x1x4x1xf32> to vector<4x1xf32>
    %129 = vector.broadcast %128 : vector<4x1xf32> to vector<4x256xf32>
    %130 = arith.mulf %126, %129 : vector<4x256xf32>
    %cst_87 = arith.constant dense<0.000000e+00> : vector<256xf32>
    %131 = vector.multi_reduction <add>, %130, %cst_87 [0] : vector<4x256xf32> to vector<256xf32>
    %132 = vector.shape_cast %131 : vector<256xf32> to vector<1x256xf32>
    %133 = arith.addf %51, %132 : vector<1x256xf32>
    %cst_88 = arith.constant 0.000000e+00 : f32
    %134 = vector.broadcast %cst_88 : f32 to vector<4x256xf32>
    %c0_89 = arith.constant 0 : index
    %c1_90 = arith.constant 1 : index
    %c0_91 = arith.constant 0 : index
    %c0_92 = arith.constant 0 : index
    %135 = vector.load %arg4[%c0_89, %c1_90, %c0_91, %c0_92] : memref<2x3x4x1xf32, #tpu.memory_space<vmem>>, vector<1x1x4x1xf32>
    %136 = vector.shape_cast %135 : vector<1x1x4x1xf32> to vector<4x1xf32>
    %137 = vector.broadcast %136 : vector<4x1xf32> to vector<4x256xf32>
    %138 = arith.addf %134, %137 : vector<4x256xf32>
    %c9 = arith.constant 9 : index
    %c0_93 = arith.constant 0 : index
    %c0_94 = arith.constant 0 : index
    %139 = vector.load %arg3[%c9, %c0_93, %c0_94] : memref<27x4x32xbf16, #tpu.memory_space<vmem>>, vector<1x4x32xbf16>
    %140 = vector.shape_cast %139 : vector<1x4x32xbf16> to vector<4x32xbf16>
    %cst_95 = arith.constant dense<0.000000e+00> : vector<4x256xf32>
    %141 = tpu.matmul %140, %47, %cst_95 {dimension_numbers = #tpu.dot_dimension_numbers<[1], [0], [0], [1], [0, 0, 1, 1], [], []>} : vector<4x32xbf16>, vector<32x256xbf16>, vector<4x256xf32> -> vector<4x256xf32>
    %c34_i32 = arith.constant 34 : i32
    %142 = tpu.dynamic_rotate %141 by %c34_i32 dim 1 : vector<4x256xf32>, i32 -> vector<4x256xf32>
    %c9_96 = arith.constant 9 : index
    %c0_97 = arith.constant 0 : index
    %143 = vector.load %arg2[%c9_96, %c0_97] : memref<27x256xf32, #tpu.memory_space<vmem>>, vector<1x256xf32>
    %144 = vector.broadcast %143 : vector<1x256xf32> to vector<4x256xf32>
    %145 = arith.mulf %142, %144 : vector<4x256xf32>
    %146 = arith.addf %138, %145 : vector<4x256xf32>
    %c10 = arith.constant 10 : index
    %c0_98 = arith.constant 0 : index
    %c0_99 = arith.constant 0 : index
    %147 = vector.load %arg3[%c10, %c0_98, %c0_99] : memref<27x4x32xbf16, #tpu.memory_space<vmem>>, vector<1x4x32xbf16>
    %148 = vector.shape_cast %147 : vector<1x4x32xbf16> to vector<4x32xbf16>
    %cst_100 = arith.constant dense<0.000000e+00> : vector<4x256xf32>
    %149 = tpu.matmul %148, %47, %cst_100 {dimension_numbers = #tpu.dot_dimension_numbers<[1], [0], [0], [1], [0, 0, 1, 1], [], []>} : vector<4x32xbf16>, vector<32x256xbf16>, vector<4x256xf32> -> vector<4x256xf32>
    %c32_i32 = arith.constant 32 : i32
    %150 = tpu.dynamic_rotate %149 by %c32_i32 dim 1 : vector<4x256xf32>, i32 -> vector<4x256xf32>
    %c10_101 = arith.constant 10 : index
    %c0_102 = arith.constant 0 : index
    %151 = vector.load %arg2[%c10_101, %c0_102] : memref<27x256xf32, #tpu.memory_space<vmem>>, vector<1x256xf32>
    %152 = vector.broadcast %151 : vector<1x256xf32> to vector<4x256xf32>
    %153 = arith.mulf %150, %152 : vector<4x256xf32>
    %154 = arith.addf %146, %153 : vector<4x256xf32>
    %c11 = arith.constant 11 : index
    %c0_103 = arith.constant 0 : index
    %c0_104 = arith.constant 0 : index
    %155 = vector.load %arg3[%c11, %c0_103, %c0_104] : memref<27x4x32xbf16, #tpu.memory_space<vmem>>, vector<1x4x32xbf16>
    %156 = vector.shape_cast %155 : vector<1x4x32xbf16> to vector<4x32xbf16>
    %cst_105 = arith.constant dense<0.000000e+00> : vector<4x256xf32>
    %157 = tpu.matmul %156, %47, %cst_105 {dimension_numbers = #tpu.dot_dimension_numbers<[1], [0], [0], [1], [0, 0, 1, 1], [], []>} : vector<4x32xbf16>, vector<32x256xbf16>, vector<4x256xf32> -> vector<4x256xf32>
    %c30_i32 = arith.constant 30 : i32
    %158 = tpu.dynamic_rotate %157 by %c30_i32 dim 1 : vector<4x256xf32>, i32 -> vector<4x256xf32>
    %c11_106 = arith.constant 11 : index
    %c0_107 = arith.constant 0 : index
    %159 = vector.load %arg2[%c11_106, %c0_107] : memref<27x256xf32, #tpu.memory_space<vmem>>, vector<1x256xf32>
    %160 = vector.broadcast %159 : vector<1x256xf32> to vector<4x256xf32>
    %161 = arith.mulf %158, %160 : vector<4x256xf32>
    %162 = arith.addf %154, %161 : vector<4x256xf32>
    %c12 = arith.constant 12 : index
    %c0_108 = arith.constant 0 : index
    %c0_109 = arith.constant 0 : index
    %163 = vector.load %arg3[%c12, %c0_108, %c0_109] : memref<27x4x32xbf16, #tpu.memory_space<vmem>>, vector<1x4x32xbf16>
    %164 = vector.shape_cast %163 : vector<1x4x32xbf16> to vector<4x32xbf16>
    %cst_110 = arith.constant dense<0.000000e+00> : vector<4x256xf32>
    %165 = tpu.matmul %164, %47, %cst_110 {dimension_numbers = #tpu.dot_dimension_numbers<[1], [0], [0], [1], [0, 0, 1, 1], [], []>} : vector<4x32xbf16>, vector<32x256xbf16>, vector<4x256xf32> -> vector<4x256xf32>
    %c2_i32 = arith.constant 2 : i32
    %166 = tpu.dynamic_rotate %165 by %c2_i32 dim 1 : vector<4x256xf32>, i32 -> vector<4x256xf32>
    %c12_111 = arith.constant 12 : index
    %c0_112 = arith.constant 0 : index
    %167 = vector.load %arg2[%c12_111, %c0_112] : memref<27x256xf32, #tpu.memory_space<vmem>>, vector<1x256xf32>
    %168 = vector.broadcast %167 : vector<1x256xf32> to vector<4x256xf32>
    %169 = arith.mulf %166, %168 : vector<4x256xf32>
    %170 = arith.addf %162, %169 : vector<4x256xf32>
    %c13 = arith.constant 13 : index
    %c0_113 = arith.constant 0 : index
    %c0_114 = arith.constant 0 : index
    %171 = vector.load %arg3[%c13, %c0_113, %c0_114] : memref<27x4x32xbf16, #tpu.memory_space<vmem>>, vector<1x4x32xbf16>
    %172 = vector.shape_cast %171 : vector<1x4x32xbf16> to vector<4x32xbf16>
    %cst_115 = arith.constant dense<0.000000e+00> : vector<4x256xf32>
    %173 = tpu.matmul %172, %47, %cst_115 {dimension_numbers = #tpu.dot_dimension_numbers<[1], [0], [0], [1], [0, 0, 1, 1], [], []>} : vector<4x32xbf16>, vector<32x256xbf16>, vector<4x256xf32> -> vector<4x256xf32>
    %174 = arith.addf %170, %173 : vector<4x256xf32>
    %c14 = arith.constant 14 : index
    %c0_116 = arith.constant 0 : index
    %c0_117 = arith.constant 0 : index
    %175 = vector.load %arg3[%c14, %c0_116, %c0_117] : memref<27x4x32xbf16, #tpu.memory_space<vmem>>, vector<1x4x32xbf16>
    %176 = vector.shape_cast %175 : vector<1x4x32xbf16> to vector<4x32xbf16>
    %cst_118 = arith.constant dense<0.000000e+00> : vector<4x256xf32>
    %177 = tpu.matmul %176, %47, %cst_118 {dimension_numbers = #tpu.dot_dimension_numbers<[1], [0], [0], [1], [0, 0, 1, 1], [], []>} : vector<4x32xbf16>, vector<32x256xbf16>, vector<4x256xf32> -> vector<4x256xf32>
    %c254_i32 = arith.constant 254 : i32
    %178 = tpu.dynamic_rotate %177 by %c254_i32 dim 1 : vector<4x256xf32>, i32 -> vector<4x256xf32>
    %c14_119 = arith.constant 14 : index
    %c0_120 = arith.constant 0 : index
    %179 = vector.load %arg2[%c14_119, %c0_120] : memref<27x256xf32, #tpu.memory_space<vmem>>, vector<1x256xf32>
    %180 = vector.broadcast %179 : vector<1x256xf32> to vector<4x256xf32>
    %181 = arith.mulf %178, %180 : vector<4x256xf32>
    %182 = arith.addf %174, %181 : vector<4x256xf32>
    %c15 = arith.constant 15 : index
    %c0_121 = arith.constant 0 : index
    %c0_122 = arith.constant 0 : index
    %183 = vector.load %arg3[%c15, %c0_121, %c0_122] : memref<27x4x32xbf16, #tpu.memory_space<vmem>>, vector<1x4x32xbf16>
    %184 = vector.shape_cast %183 : vector<1x4x32xbf16> to vector<4x32xbf16>
    %cst_123 = arith.constant dense<0.000000e+00> : vector<4x256xf32>
    %185 = tpu.matmul %184, %47, %cst_123 {dimension_numbers = #tpu.dot_dimension_numbers<[1], [0], [0], [1], [0, 0, 1, 1], [], []>} : vector<4x32xbf16>, vector<32x256xbf16>, vector<4x256xf32> -> vector<4x256xf32>
    %c226_i32 = arith.constant 226 : i32
    %186 = tpu.dynamic_rotate %185 by %c226_i32 dim 1 : vector<4x256xf32>, i32 -> vector<4x256xf32>
    %c15_124 = arith.constant 15 : index
    %c0_125 = arith.constant 0 : index
    %187 = vector.load %arg2[%c15_124, %c0_125] : memref<27x256xf32, #tpu.memory_space<vmem>>, vector<1x256xf32>
    %188 = vector.broadcast %187 : vector<1x256xf32> to vector<4x256xf32>
    %189 = arith.mulf %186, %188 : vector<4x256xf32>
    %190 = arith.addf %182, %189 : vector<4x256xf32>
    %c16 = arith.constant 16 : index
    %c0_126 = arith.constant 0 : index
    %c0_127 = arith.constant 0 : index
    %191 = vector.load %arg3[%c16, %c0_126, %c0_127] : memref<27x4x32xbf16, #tpu.memory_space<vmem>>, vector<1x4x32xbf16>
    %192 = vector.shape_cast %191 : vector<1x4x32xbf16> to vector<4x32xbf16>
    %cst_128 = arith.constant dense<0.000000e+00> : vector<4x256xf32>
    %193 = tpu.matmul %192, %47, %cst_128 {dimension_numbers = #tpu.dot_dimension_numbers<[1], [0], [0], [1], [0, 0, 1, 1], [], []>} : vector<4x32xbf16>, vector<32x256xbf16>, vector<4x256xf32> -> vector<4x256xf32>
    %c224_i32 = arith.constant 224 : i32
    %194 = tpu.dynamic_rotate %193 by %c224_i32 dim 1 : vector<4x256xf32>, i32 -> vector<4x256xf32>
    %c16_129 = arith.constant 16 : index
    %c0_130 = arith.constant 0 : index
    %195 = vector.load %arg2[%c16_129, %c0_130] : memref<27x256xf32, #tpu.memory_space<vmem>>, vector<1x256xf32>
    %196 = vector.broadcast %195 : vector<1x256xf32> to vector<4x256xf32>
    %197 = arith.mulf %194, %196 : vector<4x256xf32>
    %198 = arith.addf %190, %197 : vector<4x256xf32>
    %c17 = arith.constant 17 : index
    %c0_131 = arith.constant 0 : index
    %c0_132 = arith.constant 0 : index
    %199 = vector.load %arg3[%c17, %c0_131, %c0_132] : memref<27x4x32xbf16, #tpu.memory_space<vmem>>, vector<1x4x32xbf16>
    %200 = vector.shape_cast %199 : vector<1x4x32xbf16> to vector<4x32xbf16>
    %cst_133 = arith.constant dense<0.000000e+00> : vector<4x256xf32>
    %201 = tpu.matmul %200, %47, %cst_133 {dimension_numbers = #tpu.dot_dimension_numbers<[1], [0], [0], [1], [0, 0, 1, 1], [], []>} : vector<4x32xbf16>, vector<32x256xbf16>, vector<4x256xf32> -> vector<4x256xf32>
    %c222_i32 = arith.constant 222 : i32
    %202 = tpu.dynamic_rotate %201 by %c222_i32 dim 1 : vector<4x256xf32>, i32 -> vector<4x256xf32>
    %c17_134 = arith.constant 17 : index
    %c0_135 = arith.constant 0 : index
    %203 = vector.load %arg2[%c17_134, %c0_135] : memref<27x256xf32, #tpu.memory_space<vmem>>, vector<1x256xf32>
    %204 = vector.broadcast %203 : vector<1x256xf32> to vector<4x256xf32>
    %205 = arith.mulf %202, %204 : vector<4x256xf32>
    %206 = arith.addf %198, %205 : vector<4x256xf32>
    %cst_136 = arith.constant 0.000000e+00 : f32
    %207 = vector.broadcast %cst_136 : f32 to vector<4x256xf32>
    %208 = arith.maximumf %206, %207 : vector<4x256xf32>
    %c1_137 = arith.constant 1 : index
    %c1_138 = arith.constant 1 : index
    %c0_139 = arith.constant 0 : index
    %c0_140 = arith.constant 0 : index
    %209 = vector.load %arg4[%c1_137, %c1_138, %c0_139, %c0_140] : memref<2x3x4x1xf32, #tpu.memory_space<vmem>>, vector<1x1x4x1xf32>
    %210 = vector.shape_cast %209 : vector<1x1x4x1xf32> to vector<4x1xf32>
    %211 = vector.broadcast %210 : vector<4x1xf32> to vector<4x256xf32>
    %212 = arith.mulf %208, %211 : vector<4x256xf32>
    %cst_141 = arith.constant dense<0.000000e+00> : vector<256xf32>
    %213 = vector.multi_reduction <add>, %212, %cst_141 [0] : vector<4x256xf32> to vector<256xf32>
    %214 = vector.shape_cast %213 : vector<256xf32> to vector<1x256xf32>
    %215 = arith.addf %133, %214 : vector<1x256xf32>
    %cst_142 = arith.constant 0.000000e+00 : f32
    %216 = vector.broadcast %cst_142 : f32 to vector<4x256xf32>
    %c0_143 = arith.constant 0 : index
    %c2_144 = arith.constant 2 : index
    %c0_145 = arith.constant 0 : index
    %c0_146 = arith.constant 0 : index
    %217 = vector.load %arg4[%c0_143, %c2_144, %c0_145, %c0_146] : memref<2x3x4x1xf32, #tpu.memory_space<vmem>>, vector<1x1x4x1xf32>
    %218 = vector.shape_cast %217 : vector<1x1x4x1xf32> to vector<4x1xf32>
    %219 = vector.broadcast %218 : vector<4x1xf32> to vector<4x256xf32>
    %220 = arith.addf %216, %219 : vector<4x256xf32>
    %c18 = arith.constant 18 : index
    %c0_147 = arith.constant 0 : index
    %c0_148 = arith.constant 0 : index
    %221 = vector.load %arg3[%c18, %c0_147, %c0_148] : memref<27x4x32xbf16, #tpu.memory_space<vmem>>, vector<1x4x32xbf16>
    %222 = vector.shape_cast %221 : vector<1x4x32xbf16> to vector<4x32xbf16>
    %cst_149 = arith.constant dense<0.000000e+00> : vector<4x256xf32>
    %223 = tpu.matmul %222, %47, %cst_149 {dimension_numbers = #tpu.dot_dimension_numbers<[1], [0], [0], [1], [0, 0, 1, 1], [], []>} : vector<4x32xbf16>, vector<32x256xbf16>, vector<4x256xf32> -> vector<4x256xf32>
    %c51_i32 = arith.constant 51 : i32
    %224 = tpu.dynamic_rotate %223 by %c51_i32 dim 1 : vector<4x256xf32>, i32 -> vector<4x256xf32>
    %c18_150 = arith.constant 18 : index
    %c0_151 = arith.constant 0 : index
    %225 = vector.load %arg2[%c18_150, %c0_151] : memref<27x256xf32, #tpu.memory_space<vmem>>, vector<1x256xf32>
    %226 = vector.broadcast %225 : vector<1x256xf32> to vector<4x256xf32>
    %227 = arith.mulf %224, %226 : vector<4x256xf32>
    %228 = arith.addf %220, %227 : vector<4x256xf32>
    %c19 = arith.constant 19 : index
    %c0_152 = arith.constant 0 : index
    %c0_153 = arith.constant 0 : index
    %229 = vector.load %arg3[%c19, %c0_152, %c0_153] : memref<27x4x32xbf16, #tpu.memory_space<vmem>>, vector<1x4x32xbf16>
    %230 = vector.shape_cast %229 : vector<1x4x32xbf16> to vector<4x32xbf16>
    %cst_154 = arith.constant dense<0.000000e+00> : vector<4x256xf32>
    %231 = tpu.matmul %230, %47, %cst_154 {dimension_numbers = #tpu.dot_dimension_numbers<[1], [0], [0], [1], [0, 0, 1, 1], [], []>} : vector<4x32xbf16>, vector<32x256xbf16>, vector<4x256xf32> -> vector<4x256xf32>
    %c48_i32 = arith.constant 48 : i32
    %232 = tpu.dynamic_rotate %231 by %c48_i32 dim 1 : vector<4x256xf32>, i32 -> vector<4x256xf32>
    %c19_155 = arith.constant 19 : index
    %c0_156 = arith.constant 0 : index
    %233 = vector.load %arg2[%c19_155, %c0_156] : memref<27x256xf32, #tpu.memory_space<vmem>>, vector<1x256xf32>
    %234 = vector.broadcast %233 : vector<1x256xf32> to vector<4x256xf32>
    %235 = arith.mulf %232, %234 : vector<4x256xf32>
    %236 = arith.addf %228, %235 : vector<4x256xf32>
    %c20 = arith.constant 20 : index
    %c0_157 = arith.constant 0 : index
    %c0_158 = arith.constant 0 : index
    %237 = vector.load %arg3[%c20, %c0_157, %c0_158] : memref<27x4x32xbf16, #tpu.memory_space<vmem>>, vector<1x4x32xbf16>
    %238 = vector.shape_cast %237 : vector<1x4x32xbf16> to vector<4x32xbf16>
    %cst_159 = arith.constant dense<0.000000e+00> : vector<4x256xf32>
    %239 = tpu.matmul %238, %47, %cst_159 {dimension_numbers = #tpu.dot_dimension_numbers<[1], [0], [0], [1], [0, 0, 1, 1], [], []>} : vector<4x32xbf16>, vector<32x256xbf16>, vector<4x256xf32> -> vector<4x256xf32>
    %c45_i32 = arith.constant 45 : i32
    %240 = tpu.dynamic_rotate %239 by %c45_i32 dim 1 : vector<4x256xf32>, i32 -> vector<4x256xf32>
    %c20_160 = arith.constant 20 : index
    %c0_161 = arith.constant 0 : index
    %241 = vector.load %arg2[%c20_160, %c0_161] : memref<27x256xf32, #tpu.memory_space<vmem>>, vector<1x256xf32>
    %242 = vector.broadcast %241 : vector<1x256xf32> to vector<4x256xf32>
    %243 = arith.mulf %240, %242 : vector<4x256xf32>
    %244 = arith.addf %236, %243 : vector<4x256xf32>
    %c21 = arith.constant 21 : index
    %c0_162 = arith.constant 0 : index
    %c0_163 = arith.constant 0 : index
    %245 = vector.load %arg3[%c21, %c0_162, %c0_163] : memref<27x4x32xbf16, #tpu.memory_space<vmem>>, vector<1x4x32xbf16>
    %246 = vector.shape_cast %245 : vector<1x4x32xbf16> to vector<4x32xbf16>
    %cst_164 = arith.constant dense<0.000000e+00> : vector<4x256xf32>
    %247 = tpu.matmul %246, %47, %cst_164 {dimension_numbers = #tpu.dot_dimension_numbers<[1], [0], [0], [1], [0, 0, 1, 1], [], []>} : vector<4x32xbf16>, vector<32x256xbf16>, vector<4x256xf32> -> vector<4x256xf32>
    %c3_i32 = arith.constant 3 : i32
    %248 = tpu.dynamic_rotate %247 by %c3_i32 dim 1 : vector<4x256xf32>, i32 -> vector<4x256xf32>
    %c21_165 = arith.constant 21 : index
    %c0_166 = arith.constant 0 : index
    %249 = vector.load %arg2[%c21_165, %c0_166] : memref<27x256xf32, #tpu.memory_space<vmem>>, vector<1x256xf32>
    %250 = vector.broadcast %249 : vector<1x256xf32> to vector<4x256xf32>
    %251 = arith.mulf %248, %250 : vector<4x256xf32>
    %252 = arith.addf %244, %251 : vector<4x256xf32>
    %c22 = arith.constant 22 : index
    %c0_167 = arith.constant 0 : index
    %c0_168 = arith.constant 0 : index
    %253 = vector.load %arg3[%c22, %c0_167, %c0_168] : memref<27x4x32xbf16, #tpu.memory_space<vmem>>, vector<1x4x32xbf16>
    %254 = vector.shape_cast %253 : vector<1x4x32xbf16> to vector<4x32xbf16>
    %cst_169 = arith.constant dense<0.000000e+00> : vector<4x256xf32>
    %255 = tpu.matmul %254, %47, %cst_169 {dimension_numbers = #tpu.dot_dimension_numbers<[1], [0], [0], [1], [0, 0, 1, 1], [], []>} : vector<4x32xbf16>, vector<32x256xbf16>, vector<4x256xf32> -> vector<4x256xf32>
    %256 = arith.addf %252, %255 : vector<4x256xf32>
    %c23 = arith.constant 23 : index
    %c0_170 = arith.constant 0 : index
    %c0_171 = arith.constant 0 : index
    %257 = vector.load %arg3[%c23, %c0_170, %c0_171] : memref<27x4x32xbf16, #tpu.memory_space<vmem>>, vector<1x4x32xbf16>
    %258 = vector.shape_cast %257 : vector<1x4x32xbf16> to vector<4x32xbf16>
    %cst_172 = arith.constant dense<0.000000e+00> : vector<4x256xf32>
    %259 = tpu.matmul %258, %47, %cst_172 {dimension_numbers = #tpu.dot_dimension_numbers<[1], [0], [0], [1], [0, 0, 1, 1], [], []>} : vector<4x32xbf16>, vector<32x256xbf16>, vector<4x256xf32> -> vector<4x256xf32>
    %c253_i32 = arith.constant 253 : i32
    %260 = tpu.dynamic_rotate %259 by %c253_i32 dim 1 : vector<4x256xf32>, i32 -> vector<4x256xf32>
    %c23_173 = arith.constant 23 : index
    %c0_174 = arith.constant 0 : index
    %261 = vector.load %arg2[%c23_173, %c0_174] : memref<27x256xf32, #tpu.memory_space<vmem>>, vector<1x256xf32>
    %262 = vector.broadcast %261 : vector<1x256xf32> to vector<4x256xf32>
    %263 = arith.mulf %260, %262 : vector<4x256xf32>
    %264 = arith.addf %256, %263 : vector<4x256xf32>
    %c24 = arith.constant 24 : index
    %c0_175 = arith.constant 0 : index
    %c0_176 = arith.constant 0 : index
    %265 = vector.load %arg3[%c24, %c0_175, %c0_176] : memref<27x4x32xbf16, #tpu.memory_space<vmem>>, vector<1x4x32xbf16>
    %266 = vector.shape_cast %265 : vector<1x4x32xbf16> to vector<4x32xbf16>
    %cst_177 = arith.constant dense<0.000000e+00> : vector<4x256xf32>
    %267 = tpu.matmul %266, %47, %cst_177 {dimension_numbers = #tpu.dot_dimension_numbers<[1], [0], [0], [1], [0, 0, 1, 1], [], []>} : vector<4x32xbf16>, vector<32x256xbf16>, vector<4x256xf32> -> vector<4x256xf32>
    %c211_i32 = arith.constant 211 : i32
    %268 = tpu.dynamic_rotate %267 by %c211_i32 dim 1 : vector<4x256xf32>, i32 -> vector<4x256xf32>
    %c24_178 = arith.constant 24 : index
    %c0_179 = arith.constant 0 : index
    %269 = vector.load %arg2[%c24_178, %c0_179] : memref<27x256xf32, #tpu.memory_space<vmem>>, vector<1x256xf32>
    %270 = vector.broadcast %269 : vector<1x256xf32> to vector<4x256xf32>
    %271 = arith.mulf %268, %270 : vector<4x256xf32>
    %272 = arith.addf %264, %271 : vector<4x256xf32>
    %c25 = arith.constant 25 : index
    %c0_180 = arith.constant 0 : index
    %c0_181 = arith.constant 0 : index
    %273 = vector.load %arg3[%c25, %c0_180, %c0_181] : memref<27x4x32xbf16, #tpu.memory_space<vmem>>, vector<1x4x32xbf16>
    %274 = vector.shape_cast %273 : vector<1x4x32xbf16> to vector<4x32xbf16>
    %cst_182 = arith.constant dense<0.000000e+00> : vector<4x256xf32>
    %275 = tpu.matmul %274, %47, %cst_182 {dimension_numbers = #tpu.dot_dimension_numbers<[1], [0], [0], [1], [0, 0, 1, 1], [], []>} : vector<4x32xbf16>, vector<32x256xbf16>, vector<4x256xf32> -> vector<4x256xf32>
    %c208_i32 = arith.constant 208 : i32
    %276 = tpu.dynamic_rotate %275 by %c208_i32 dim 1 : vector<4x256xf32>, i32 -> vector<4x256xf32>
    %c25_183 = arith.constant 25 : index
    %c0_184 = arith.constant 0 : index
    %277 = vector.load %arg2[%c25_183, %c0_184] : memref<27x256xf32, #tpu.memory_space<vmem>>, vector<1x256xf32>
    %278 = vector.broadcast %277 : vector<1x256xf32> to vector<4x256xf32>
    %279 = arith.mulf %276, %278 : vector<4x256xf32>
    %280 = arith.addf %272, %279 : vector<4x256xf32>
    %c26 = arith.constant 26 : index
    %c0_185 = arith.constant 0 : index
    %c0_186 = arith.constant 0 : index
    %281 = vector.load %arg3[%c26, %c0_185, %c0_186] : memref<27x4x32xbf16, #tpu.memory_space<vmem>>, vector<1x4x32xbf16>
    %282 = vector.shape_cast %281 : vector<1x4x32xbf16> to vector<4x32xbf16>
    %cst_187 = arith.constant dense<0.000000e+00> : vector<4x256xf32>
    %283 = tpu.matmul %282, %47, %cst_187 {dimension_numbers = #tpu.dot_dimension_numbers<[1], [0], [0], [1], [0, 0, 1, 1], [], []>} : vector<4x32xbf16>, vector<32x256xbf16>, vector<4x256xf32> -> vector<4x256xf32>
    %c205_i32 = arith.constant 205 : i32
    %284 = tpu.dynamic_rotate %283 by %c205_i32 dim 1 : vector<4x256xf32>, i32 -> vector<4x256xf32>
    %c26_188 = arith.constant 26 : index
    %c0_189 = arith.constant 0 : index
    %285 = vector.load %arg2[%c26_188, %c0_189] : memref<27x256xf32, #tpu.memory_space<vmem>>, vector<1x256xf32>
    %286 = vector.broadcast %285 : vector<1x256xf32> to vector<4x256xf32>
    %287 = arith.mulf %284, %286 : vector<4x256xf32>
    %288 = arith.addf %280, %287 : vector<4x256xf32>
    %cst_190 = arith.constant 0.000000e+00 : f32
    %289 = vector.broadcast %cst_190 : f32 to vector<4x256xf32>
    %290 = arith.maximumf %288, %289 : vector<4x256xf32>
    %c1_191 = arith.constant 1 : index
    %c2_192 = arith.constant 2 : index
    %c0_193 = arith.constant 0 : index
    %c0_194 = arith.constant 0 : index
    %291 = vector.load %arg4[%c1_191, %c2_192, %c0_193, %c0_194] : memref<2x3x4x1xf32, #tpu.memory_space<vmem>>, vector<1x1x4x1xf32>
    %292 = vector.shape_cast %291 : vector<1x1x4x1xf32> to vector<4x1xf32>
    %293 = vector.broadcast %292 : vector<4x1xf32> to vector<4x256xf32>
    %294 = arith.mulf %290, %293 : vector<4x256xf32>
    %cst_195 = arith.constant dense<0.000000e+00> : vector<256xf32>
    %295 = vector.multi_reduction <add>, %294, %cst_195 [0] : vector<4x256xf32> to vector<256xf32>
    %296 = vector.shape_cast %295 : vector<256xf32> to vector<1x256xf32>
    %297 = arith.addf %215, %296 : vector<1x256xf32>
    %298 = arith.negf %297 : vector<1x256xf32>
    %299 = math.exp %298 : vector<1x256xf32>
    %cst_196 = arith.constant 1.000000e+00 : f32
    %300 = vector.broadcast %cst_196 : f32 to vector<1x256xf32>
    %301 = arith.addf %300, %299 : vector<1x256xf32>
    %302 = arith.divf %300, %301 : vector<1x256xf32>
    %303 = vector.broadcast %43 : vector<32x1xf32> to vector<32x256xf32>
    %304 = vector.broadcast %302 : vector<1x256xf32> to vector<32x256xf32>
    %305 = arith.mulf %303, %304 : vector<32x256xf32>
    %306 = arith.mulf %1, %305 : vector<32x256xf32>
    %c0_197 = arith.constant 0 : index
    %c0_198 = arith.constant 0 : index
    %c0_199 = arith.constant 0 : index
    %307 = vector.load %arg9[%c0_197, %c0_198, %c0_199] : memref<1x32x256xf32, #tpu.memory_space<vmem>>, vector<1x32x256xf32>
    %308 = vector.shape_cast %307 : vector<1x32x256xf32> to vector<32x256xf32>
    %309 = vector.shape_cast %306 : vector<32x256xf32> to vector<1x32x256xf32>
    tpu.vector_store %arg9[%c0_197, %c0_198, %c0_199], %309 {strides = array<i32>} : memref<1x32x256xf32, #tpu.memory_space<vmem>>, vector<1x32x256xf32>,
    return
  }
  func.func @transform_0(%arg0: i32) -> (i32, i32, i32) {
    %c0_i32 = arith.constant 0 : i32
    %c0_i32_0 = arith.constant 0 : i32
    %c0_i32_1 = arith.constant 0 : i32
    return %arg0, %c0_i32, %c0_i32_0 : i32, i32, i32
  }
  func.func @transform_1(%arg0: i32) -> (i32, i32) {
    %c0_i32 = arith.constant 0 : i32
    %c0_i32_0 = arith.constant 0 : i32
    %c0_i32_1 = arith.constant 0 : i32
    return %c0_i32, %c0_i32_0 : i32, i32
  }
  func.func @transform_2(%arg0: i32) -> (i32, i32, i32) {
    %c0_i32 = arith.constant 0 : i32
    %c0_i32_0 = arith.constant 0 : i32
    %c0_i32_1 = arith.constant 0 : i32
    %c0_i32_2 = arith.constant 0 : i32
    return %c0_i32, %c0_i32_0, %c0_i32_1 : i32, i32, i32
  }
  func.func @transform_3(%arg0: i32) -> (i32, i32, i32, i32) {
    %c0_i32 = arith.constant 0 : i32
    %c0_i32_0 = arith.constant 0 : i32
    %c0_i32_1 = arith.constant 0 : i32
    %c0_i32_2 = arith.constant 0 : i32
    %c0_i32_3 = arith.constant 0 : i32
    return %c0_i32, %c0_i32_0, %c0_i32_1, %c0_i32_2 : i32, i32, i32, i32
  }
  func.func @transform_4(%arg0: i32) -> (i32, i32, i32) {
    %c0_i32 = arith.constant 0 : i32
    %c0_i32_0 = arith.constant 0 : i32
    %c0_i32_1 = arith.constant 0 : i32
    %c0_i32_2 = arith.constant 0 : i32
    return %c0_i32, %c0_i32_0, %c0_i32_1 : i32, i32, i32
  }
  func.func @transform_5(%arg0: i32) -> (i32, i32, i32) {
    %c0_i32 = arith.constant 0 : i32
    %c0_i32_0 = arith.constant 0 : i32
    %c0_i32_1 = arith.constant 0 : i32
    %c0_i32_2 = arith.constant 0 : i32
    return %c0_i32, %c0_i32_0, %c0_i32_1 : i32, i32, i32
  }
  func.func @transform_6(%arg0: i32) -> (i32, i32) {
    %c0_i32 = arith.constant 0 : i32
    %c0_i32_0 = arith.constant 0 : i32
    %c0_i32_1 = arith.constant 0 : i32
    return %c0_i32, %c0_i32_0 : i32, i32
  }
  func.func @transform_7(%arg0: i32) -> (i32, i32) {
    %c0_i32 = arith.constant 0 : i32
    %c0_i32_0 = arith.constant 0 : i32
    %c0_i32_1 = arith.constant 0 : i32
    return %c0_i32, %c0_i32_0 : i32, i32
  }
  func.func @transform_8(%arg0: i32) -> (i32, i32, i32) {
    %c0_i32 = arith.constant 0 : i32
    %c0_i32_0 = arith.constant 0 : i32
    %c0_i32_1 = arith.constant 0 : i32
    return %arg0, %c0_i32, %c0_i32_0 : i32, i32, i32
  }
  func.func @transform_9(%arg0: i32) -> (i32, i32, i32) {
    %c0_i32 = arith.constant 0 : i32
    %c0_i32_0 = arith.constant 0 : i32
    %c0_i32_1 = arith.constant 0 : i32
    return %arg0, %c0_i32, %c0_i32_0 : i32, i32, i32
  }
}

</mosaic_0001>

<bundles_post_ra>
// kernel: attention_part_forward.1
= control target key start
LH: loop header
LB: loop body
LE: loop exit
PB: predicated region body
PF: predicated region fallthrough
CT: control target
= control target key end

     0   :  { %s2853_s11 = smov 0   ;;  %s3499_s0 = inlined_call_operand.vmem [shape: f32[2,32,256], index: 0, kind: input, shape index: {}]   ;;  %s3500_s1 = inlined_call_operand.vmem [shape: f32[27,256], index: 1, kind: input, shape index: {}]   ;;  %s3501_s2 = inlined_call_operand.vmem [shape: bf16[27,4,32], index: 2, kind: input, shape index: {}]   ;;  %s3502_s3 = inlined_call_operand.vmem [shape: f32[2,3,4,1], index: 3, kind: input, shape index: {}]   ;;  %s3503_s4 = inlined_call_operand.vmem [shape: f32[3,32,2], index: 4, kind: input, shape index: {}]   ;;  %s3504_s5 = inlined_call_operand.vmem [shape: f32[2,1,2], index: 5, kind: input, shape index: {}]   ;;  %s3505_s6 = inlined_call_operand.vmem [shape: f32[32,1], index: 6, kind: input, shape index: {}]   ;;  %s3506_s7 = inlined_call_operand.<no memory space> [shape: f32[1,1], index: 7, kind: input, shape index: {}]   ;;  %s3507_s8 = inlined_call_operand.vmem [shape: f32[2,32,256], index: 8, kind: output, shape index: {0}]   ;;  %s3508_s9 = inlined_call_operand.vmem [shape: f32[2,32,1], index: 9, kind: output, shape index: {1}]  }
   0x1   :  { %v15_v0 = vstv %s3506_s7 }
   0x2   :  { %16 = vst [vmem:[#allocation2] sm:$0x1] %v15_v0 }
   0x3 LB: > { %s2588_s12 = sadd.s32 4294967295, %s2773_s11   ;;  %p2592_p0 = scmp.ge.s32.totalorder %s2773_s11, 1  ;;  %s2773_s11 = sphi %s2853_s11, %s22_s11  }
   0x4   : > { %p292_p1 = scmp.lt.s32.totalorder %s2773_s11, 3 }
   0x6   : > { %p293_p2 = pnand %p2592_p0, %p292_p1 }
   0x7   : > { %p333_p3 = scmp.lt.s32.totalorder (!%p293_p2), %s2588_s12, 1  ;;  %v2775_v1 = vmov (!%p293_p2), 0   ;;  %v521_v18 = vld [vmem:[%s3501_s2] sm:$0x3] (!%p293_p2)  ;;  %vm522_vm0 = vcmask (!%p293_p2), 261120   ;;  %v386_v62 = vld [vmem:[%s3503_s4 + $0x8] sm:$0xff] (!%p293_p2) }
   0x8   : > { %296 = sbr.rel (%p293_p2) target bundleno = 529 (0x211), region = 52  ;;  %558 = vmatprep.mubr.bf16.mxu0 (!%p293_p2), %v2775_v1  ;;  %629 = vmatprep.mubr.bf16.mxu1 (!%p293_p2), %v2775_v1  ;;  %v2613_v20 = vld [vmem:[%s3501_s2 + $0x2] sm:$0x3] (!%p293_p2)  ;;  %v2616_v24 = vld [vmem:[%s3501_s2 + $0x4] sm:$0x3] (!%p293_p2)  ;;  %vm393_vm1 = vcmask (!%p293_p2), 15360  }
   0x9   : > { %2734 = vset.pattern.permute.xlu1 (!%p293_p2), %v2775_v1  ;;  %2733 = vset.pattern.permute.xlu0 (!%p293_p2), %v2775_v1  ;;  %v2619_v25 = vld [vmem:[%s3501_s2 + $0x6] sm:$0x3] (!%p293_p2)  ;;  %v2622_v26 = vld [vmem:[%s3501_s2 + $0x8] sm:$0x3] (!%p293_p2)  ;;  %v2624_v27 = vld [vmem:[%s3501_s2 + $0xa] sm:$0x3] (!%p293_p2) }
   0xa   : > { %v514_v28 = vld [vmem:[%s3502_s3] sm:$0xf] (!%p293_p2)  ;;  %v2627_v29 = vld [vmem:[%s3501_s2 + $0xc] sm:$0x3] (!%p293_p2)  ;;  %v2630_v30 = vld [vmem:[%s3501_s2 + $0xe] sm:$0x3] (!%p293_p2) }
   0xb   : > { %v2637_v31 = vld [vmem:[%s3502_s3 + $0x4] sm:$0xf] (!%p293_p2)  ;;  %v503_v32 = vld [vmem:[#allocation2] sm:$0x1] (!%p293_p2)  ;;  %v2633_v33 = vld [vmem:[%s3501_s2 + $0x10] sm:$0x3] (!%p293_p2) }
   0xc   : > { %v2638_v34 = vld [vmem:[%s3501_s2 + $0x12] sm:$0x3] (!%p293_p2)  ;;  %v2665_v35 = vld [vmem:[%s3502_s3 + $0x8] sm:$0xf] (!%p293_p2)  ;;  %v2641_v37 = vld [vmem:[%s3501_s2 + $0x14] sm:$0x3] (!%p293_p2) }
   0xd   : > { %v2664_v36 = vld [vmem:[%s3502_s3 + $0x10] sm:$0xf] (!%p293_p2)  ;;  %v2644_v38 = vld [vmem:[%s3501_s2 + $0x16] sm:$0x3] (!%p293_p2)  ;;  %v2636_v39 = vld [vmem:[%s3502_s3 + $0xc] sm:$0xf] (!%p293_p2) }
   0xe   : > { %v2647_v40 = vld [vmem:[%s3501_s2 + $0x18] sm:$0x3] (!%p293_p2)  ;;  %v2650_v41 = vld [vmem:[%s3501_s2 + $0x1a] sm:$0x3] (!%p293_p2)  ;;  %v2652_v42 = vld [vmem:[%s3501_s2 + $0x1c] sm:$0x3] (!%p293_p2) }
   0xf   : > { %s3510_s12 = smov (!%p333_p3, %s2588_s12), 1  ;;  %v2655_v43 = vld [vmem:[%s3501_s2 + $0x1e] sm:$0x3]  ;;  %v2658_v44 = vld [vmem:[%s3501_s2 + $0x20] sm:$0x3]  ;;  %v2600_v63 = vld [vmem:[%s3503_s4 + $0x28] sm:$0xff] }
  0x10   : > { %s2697_s7 = sshll.u32 %s3510_s12, 6  ;;  %v2661_v45 = vld [vmem:[%s3501_s2 + $0x22] sm:$0x3]  ;;  %v2666_v46 = vld [vmem:[%s3501_s2 + $0x24] sm:$0x3]  ;;  %s2776_s18 = smov 17  }
  0x11   : > { %s2873_s15 = scalar_lea.vmem %s3499_s0, %s2697_s7  ;;  %v2669_v47 = vld [vmem:[%s3501_s2 + $0x26] sm:$0x3]  ;;  %v2672_v48 = vld [vmem:[%s3501_s2 + $0x28] sm:$0x3]  ;;  %v2675_v49 = vld [vmem:[%s3501_s2 + $0x2a] sm:$0x3] }
  0x12   : > { %v350_v2 = vld [vmem:[%s2873_s15 + $0x8] sm:$0xff]  ;;  %v352_v3 = vld [vmem:[%s2873_s15 + $0x18] sm:$0xff]  ;;  %v349_v4 = vld [vmem:[%s2873_s15] sm:$0xff]  ;;  %s2777_s19 = smov 16   ;;  %s2778_s20 = smov 15   ;;  %vm494_vm5 = vcmask 7168  }
  0x13   : > { %v2878_v5 = vpack.c.bf16 %v352_v3, %v350_v2  ;;  %v351_v6 = vld [vmem:[%s2873_s15 + $0x10] sm:$0xff]  ;;  %v369_v7 = vadd.f32 %v350_v2, %v349_v4  ;;  %v357_v8 = vmax.f32 %v349_v4, %v350_v2  ;;  %v354_v9 = vld [vmem:[%s2873_s15 + $0x28] sm:$0xff]  ;;  %v356_v10 = vld [vmem:[%s2873_s15 + $0x38] sm:$0xff]  ;;  %s2779_s21 = smov 1   ;;  %s2780_s22 = smov 127   ;;  %vm1141_vm12 = vcmask 1043456  }
  0x14   : > { %v2883_v11 = vpack.c.bf16 %v351_v6, %v349_v4  ;;  %v2885_v12 = vpack.c.bf16 %v356_v10, %v354_v9  ;;  %v353_v13 = vld [vmem:[%s2873_s15 + $0x20] sm:$0xff]  ;;  %v355_v14 = vld [vmem:[%s2873_s15 + $0x30] sm:$0xff]  ;;  %v372_v15 = vadd.f32 %v352_v3, %v351_v6  ;;  %v360_v17 = vmax.f32 %v351_v6, %v352_v3  ;;  %v2678_v50 = vld [vmem:[%s3501_s2 + $0x2c] sm:$0x3]  ;;  %s2781_s23 = smov 113   ;;  %s2782_s24 = smov 112  }
  0x15   : > { %526 = vmatprep.subr.bf16.mxu0 %v2878_v5  ;;  %597 = vmatprep.subr.bf16.mxu1 %v2878_v5  ;;  %v2892_v16 = vpack.c.bf16 %v355_v14, %v353_v13  ;;  %v375_v19 = vadd.f32 %v354_v9, %v353_v13  ;;  %v363_v21 = vmax.f32 %v353_v13, %v354_v9  ;;  %v2680_v51 = vld [vmem:[%s3501_s2 + $0x2e] sm:$0x3]  ;;  %v2683_v52 = vld [vmem:[%s3501_s2 + $0x30] sm:$0x3]  ;;  %v2686_v53 = vld [vmem:[%s3501_s2 + $0x32] sm:$0x3] }
  0x16   : > { %370 = vadd.xlane.f32.xlu0 %v369_v7  ;;  %527 = vmatpush1.bf16.msra.mxu0 %v2883_v11  ;;  %v378_v22 = vadd.f32 %v356_v10, %v355_v14  ;;  %v366_v23 = vmax.f32 %v355_v14, %v356_v10  ;;  %v2689_v54 = vld [vmem:[%s3501_s2 + $0x34] sm:$0x3]  ;;  %v2599_v55 = vld [vmem:[%s3503_s4 + $0x20] sm:$0xff]  ;;  %s2783_s25 = smov 34   ;;  %s2784_s26 = smov 111  }
  0x17   : > { %598 = vmatpush1.bf16.msra.mxu1 %v2883_v11  ;;  %358 = vmax.xlane.f32.xlu1 %v357_v8  ;;  %v385_v57 = vld [vmem:[%s3503_s4] sm:$0xff]  ;;  %v2601_v8 = vld [vmem:[%s3503_s4 + $0x30] sm:$0xff]  ;;  %s2785_s27 = smov 32   ;;  %s2786_s28 = smov 30  }
  0x18   : > { %528 = vmatprep.subr.bf16.mxu0 %v2885_v12  ;;  %599 = vmatprep.subr.bf16.mxu1 %v2885_v12  ;;  %v387_v10 = vld [vmem:[%s3503_s4 + $0x10] sm:$0xff]  ;;  %s2787_s29 = smov 2   ;;  %s2788_s30 = smov 126  }
  0x19   : > { %s2789_s10 = smov 98   ;;  %s2790_s13 = smov 96  }
  0x1a   : > { %373 = vadd.xlane.f32.xlu0 %v372_v15  ;;  %529 = vmatpush1.bf16.msra.mxu0 %v2892_v16  ;;  %s2791_s14 = smov 94   ;;  %s2792_s16 = smov 51  }
  0x1b   : > { %600 = vmatpush1.bf16.msra.mxu1 %v2892_v16  ;;  %361 = vmax.xlane.f32.xlu1 %v360_v17  ;;  %s2793_s17 = smov 48  }
  0x1c   : > { %667 = vmatprep.subr.bf16.mxu0 %v2878_v5  ;;  %737 = vmatprep.subr.bf16.mxu1 %v2878_v5 }
  0x1d   : > { %2612 = vmatmul.mubr.msk.bf16.vlgmr.msra.gmra.mrb[0].mxu0 %vm522_vm0, %v521_v18  ;;  %v2602_v18 = vld [vmem:[%s3503_s4 + $0x38] sm:$0xff] }
  0x1e   : > { %2614 = vmatmul.mubr.msk.bf16.vlgmr.msra.gmra.mrb[0].mxu1 %vm522_vm0, %v2613_v20  ;;  %376 = vadd.xlane.f32.xlu0 %v375_v19  ;;  %v388_v20 = vld [vmem:[%s3503_s4 + $0x18] sm:$0xff] }
  0x1f   : > { %668 = vmatpush1.bf16.msra.mxu0 %v2883_v11  ;;  %738 = vmatpush1.bf16.msra.mxu1 %v2883_v11 }
  0x20   : > { %364 = vmax.xlane.f32.xlu1 %v363_v21  ;;  %669 = vmatprep.subr.bf16.mxu0 %v2885_v12 }
  0x21   : > { %739 = vmatprep.subr.bf16.mxu1 %v2885_v12  ;;  %699 = vmatprep.mubr.bf16.mxu0 %v2775_v1 }
  0x22   : > { %379 = vadd.xlane.f32.xlu0 %v378_v22  ;;  %769 = vmatprep.mubr.bf16.mxu1 %v2775_v1 }
  0x23   : > { %670 = vmatpush1.bf16.msra.mxu0 %v2892_v16  ;;  %740 = vmatpush1.bf16.msra.mxu1 %v2892_v16 }
  0x24   : > { %367 = vmax.xlane.f32.xlu1 %v366_v23  ;;  %807 = vmatprep.subr.bf16.mxu0 %v2878_v5 }
  0x25   : > { %855 = vmatprep.subr.bf16.mxu1 %v2878_v5 }
  0x26   : > { %2617 = vmatmul.mubr.msk.bf16.vlgmr.msra.gmra.mrb[4].mxu0 %vm522_vm0, %v2616_v24  ;;  %2620 = vmatmul.mubr.msk.bf16.vlgmr.msra.gmra.mrb[4].mxu1 %vm522_vm0, %v2619_v25 }
  0x27   : > { %808 = vmatpush1.bf16.msra.mxu0 %v2883_v11  ;;  %856 = vmatpush1.bf16.msra.mxu1 %v2883_v11 }
  0x28   : > { %809 = vmatprep.subr.bf16.mxu0 %v2885_v12  ;;  %857 = vmatprep.subr.bf16.mxu1 %v2885_v12 }
  0x29   : > { %839 = vmatprep.mubr.bf16.mxu0 %v2775_v1  ;;  %887 = vmatprep.mubr.bf16.mxu1 %v2775_v1 }
  0x2b   : > { %810 = vmatpush1.bf16.msra.mxu0 %v2892_v16  ;;  %858 = vmatpush1.bf16.msra.mxu1 %v2892_v16 }
  0x2c   : > { %925 = vmatprep.subr.bf16.mxu0 %v2878_v5  ;;  %995 = vmatprep.subr.bf16.mxu1 %v2878_v5 }
  0x2e   : > { %2623 = vmatmul.mubr.msk.bf16.vlgmr.msra.gmra.mrb[8].mxu0 %vm522_vm0, %v2622_v26  ;;  %2625 = vmatmul.mubr.msk.bf16.vlgmr.msra.gmra.mrb[8].mxu1 %vm522_vm0, %v2624_v27 }
  0x2f   : > { %926 = vmatpush1.bf16.msra.mxu0 %v2883_v11  ;;  %996 = vmatpush1.bf16.msra.mxu1 %v2883_v11 }
  0x30   : > { %927 = vmatprep.subr.bf16.mxu0 %v2885_v12  ;;  %997 = vmatprep.subr.bf16.mxu1 %v2885_v12 }
  0x31   : > { %957 = vmatprep.mubr.bf16.mxu0 %v2775_v1  ;;  %1027 = vmatprep.mubr.bf16.mxu1 %v2775_v1 }
  0x33   : > { %928 = vmatpush1.bf16.msra.mxu0 %v2892_v16  ;;  %998 = vmatpush1.bf16.msra.mxu1 %v2892_v16 }
  0x34   : > { %1065 = vmatprep.subr.bf16.mxu0 %v2878_v5  ;;  %1171 = vmatprep.subr.bf16.mxu1 %v2878_v5 }
  0x35   : > { %517 = vperm.xlu1 %2734, %v514_v28  }
  0x36   : > { %2628 = vmatmul.mubr.msk.bf16.vlgmr.msra.gmra.mrb[12].mxu0 %vm522_vm0, %v2627_v29  ;;  %2631 = vmatmul.mubr.msk.bf16.vlgmr.msra.gmra.mrb[12].mxu1 %vm522_vm0, %v2630_v30 }
  0x37   : > { %1066 = vmatpush1.bf16.msra.mxu0 %v2883_v11  ;;  %1172 = vmatpush1.bf16.msra.mxu1 %v2883_v11 }
  0x38   : > { %1067 = vmatprep.subr.bf16.mxu0 %v2885_v12  ;;  %1173 = vmatprep.subr.bf16.mxu1 %v2885_v12 }
  0x39   : > { %1097 = vmatprep.mubr.bf16.mxu0 %v2775_v1  ;;  %1203 = vmatprep.mubr.bf16.mxu1 %v2775_v1 }
  0x3a   : > { %1162 = vperm.xlu1 %2734, %v2637_v31   ;;  %506 = vperm.xlu0 %2733, %v503_v32  }
  0x3b   : > { %1068 = vmatpush1.bf16.msra.mxu0 %v2892_v16  ;;  %1174 = vmatpush1.bf16.msra.mxu1 %v2892_v16 }
  0x3c   : > { %1241 = vmatprep.subr.bf16.mxu0 %v2878_v5  ;;  %1311 = vmatprep.subr.bf16.mxu1 %v2878_v5 }
  0x3e   : > { %2634 = vmatmul.mubr.msk.bf16.vlgmr.msra.gmra.mrb[16].mxu0 %vm522_vm0, %v2633_v33  ;;  %2639 = vmatmul.mubr.msk.bf16.vlgmr.msra.gmra.mrb[16].mxu1 %vm522_vm0, %v2638_v34 }
  0x3f   : > { %1242 = vmatpush1.bf16.msra.mxu0 %v2883_v11  ;;  %1312 = vmatpush1.bf16.msra.mxu1 %v2883_v11 }
  0x40   : > { %1243 = vmatprep.subr.bf16.mxu0 %v2885_v12  ;;  %1313 = vmatprep.subr.bf16.mxu1 %v2885_v12 }
  0x41   : > { %1273 = vmatprep.mubr.bf16.mxu0 %v2775_v1  ;;  %1343 = vmatprep.mubr.bf16.mxu1 %v2775_v1 }
  0x42   : > { %1805 = vperm.xlu1 %2734, %v2665_v35   ;;  %1780 = vperm.xlu0 %2733, %v2664_v36  }
  0x43   : > { %1244 = vmatpush1.bf16.msra.mxu0 %v2892_v16  ;;  %1314 = vmatpush1.bf16.msra.mxu1 %v2892_v16 }
  0x44   : > { %1381 = vmatprep.subr.bf16.mxu0 %v2878_v5  ;;  %1451 = vmatprep.subr.bf16.mxu1 %v2878_v5 }
  0x46   : > { %2642 = vmatmul.mubr.msk.bf16.vlgmr.msra.gmra.mrb[20].mxu0 %vm522_vm0, %v2641_v37  ;;  %2645 = vmatmul.mubr.msk.bf16.vlgmr.msra.gmra.mrb[20].mxu1 %vm522_vm0, %v2644_v38 }
  0x47   : > { %1382 = vmatpush1.bf16.msra.mxu0 %v2883_v11  ;;  %1452 = vmatpush1.bf16.msra.mxu1 %v2883_v11 }
  0x48   : > { %1383 = vmatprep.subr.bf16.mxu0 %v2885_v12  ;;  %1453 = vmatprep.subr.bf16.mxu1 %v2885_v12 }
  0x49   : > { %1413 = vmatprep.mubr.bf16.mxu0 %v2775_v1  ;;  %1483 = vmatprep.mubr.bf16.mxu1 %v2775_v1 }
  0x4a   : > { %1136 = vperm.xlu1 %2734, %v2636_v39  }
  0x4b   : > { %1384 = vmatpush1.bf16.msra.mxu0 %v2892_v16  ;;  %1454 = vmatpush1.bf16.msra.mxu1 %v2892_v16 }
  0x4c   : > { %1499 = vmatprep.subr.bf16.mxu0 %v2878_v5  ;;  %1569 = vmatprep.subr.bf16.mxu1 %v2878_v5 }
  0x4e   : > { %2648 = vmatmul.mubr.msk.bf16.vlgmr.msra.gmra.mrb[24].mxu0 %vm522_vm0, %v2647_v40  ;;  %2651 = vmatmul.mubr.msk.bf16.vlgmr.msra.gmra.mrb[24].mxu1 %vm522_vm0, %v2650_v41  ;;  %v442_v41 = vlaneseq }
  0x4f   : > { %1500 = vmatpush1.bf16.msra.mxu0 %v2883_v11  ;;  %1570 = vmatpush1.bf16.msra.mxu1 %v2883_v11 }
  0x50   : > { %1501 = vmatprep.subr.bf16.mxu0 %v2885_v12  ;;  %1571 = vmatprep.subr.bf16.mxu1 %v2885_v12 }
  0x51   : > { %1531 = vmatprep.mubr.bf16.mxu0 %v2775_v1  ;;  %1601 = vmatprep.mubr.bf16.mxu1 %v2775_v1 }
  0x53   : > { %1502 = vmatpush1.bf16.msra.mxu0 %v2892_v16  ;;  %1572 = vmatpush1.bf16.msra.mxu1 %v2892_v16 }
  0x54   : > { %1639 = vmatprep.subr.bf16.mxu0 %v2878_v5  ;;  %1709 = vmatprep.subr.bf16.mxu1 %v2878_v5 }
  0x56   : > { %2653 = vmatmul.mubr.msk.bf16.vlgmr.msra.gmra.mrb[28].mxu0 %vm522_vm0, %v2652_v42  ;;  %2656 = vmatmul.mubr.msk.bf16.vlgmr.msra.gmra.mrb[28].mxu1 %vm522_vm0, %v2655_v43 }
  0x57   : > { %1640 = vmatpush1.bf16.msra.mxu0 %v2883_v11  ;;  %1710 = vmatpush1.bf16.msra.mxu1 %v2883_v11 }
  0x58   : > { %1641 = vmatprep.subr.bf16.mxu0 %v2885_v12  ;;  %1711 = vmatprep.subr.bf16.mxu1 %v2885_v12 }
  0x59   : > { %1671 = vmatprep.mubr.bf16.mxu0 %v2775_v1  ;;  %1741 = vmatprep.mubr.bf16.mxu1 %v2775_v1 }
  0x5b   : > { %1642 = vmatpush1.bf16.msra.mxu0 %v2892_v16  ;;  %1712 = vmatpush1.bf16.msra.mxu1 %v2892_v16 }
  0x5c   : > { %1814 = vmatprep.subr.bf16.mxu0 %v2878_v5  ;;  %1884 = vmatprep.subr.bf16.mxu1 %v2878_v5 }
  0x5e   : > { %2659 = vmatmul.mubr.msk.bf16.vlgmr.msra.gmra.mrb[32].mxu0 %vm522_vm0, %v2658_v44  ;;  %2662 = vmatmul.mubr.msk.bf16.vlgmr.msra.gmra.mrb[32].mxu1 %vm522_vm0, %v2661_v45  ;;  %v2603_v44 = vld [vmem:[%s3504_s5 + $0x1] sm:$0x1]  ;;  %v407_v45 = vld [vmem:[%s3504_s5] sm:$0x1] }
  0x5f   : > { %1815 = vmatpush1.bf16.msra.mxu0 %v2883_v11  ;;  %1885 = vmatpush1.bf16.msra.mxu1 %v2883_v11 }
  0x60   : > { %1816 = vmatprep.subr.bf16.mxu0 %v2885_v12  ;;  %1886 = vmatprep.subr.bf16.mxu1 %v2885_v12 }
  0x61   : > { %1846 = vmatprep.mubr.bf16.mxu0 %v2775_v1  ;;  %1916 = vmatprep.mubr.bf16.mxu1 %v2775_v1 }
  0x63   : > { %1817 = vmatpush1.bf16.msra.mxu0 %v2892_v16  ;;  %1887 = vmatpush1.bf16.msra.mxu1 %v2892_v16 }
  0x64   : > { %1954 = vmatprep.subr.bf16.mxu0 %v2878_v5  ;;  %2024 = vmatprep.subr.bf16.mxu1 %v2878_v5 }
  0x66   : > { %2667 = vmatmul.mubr.msk.bf16.vlgmr.msra.gmra.mrb[36].mxu0 %vm522_vm0, %v2666_v46  ;;  %2670 = vmatmul.mubr.msk.bf16.vlgmr.msra.gmra.mrb[36].mxu1 %vm522_vm0, %v2669_v47 }
  0x67   : > { %1955 = vmatpush1.bf16.msra.mxu0 %v2883_v11  ;;  %2025 = vmatpush1.bf16.msra.mxu1 %v2883_v11 }
  0x68   : > { %1956 = vmatprep.subr.bf16.mxu0 %v2885_v12  ;;  %2026 = vmatprep.subr.bf16.mxu1 %v2885_v12 }
  0x69   : > { %1986 = vmatprep.mubr.bf16.mxu0 %v2775_v1  ;;  %2056 = vmatprep.mubr.bf16.mxu1 %v2775_v1 }
  0x6b   : > { %1957 = vmatpush1.bf16.msra.mxu0 %v2892_v16  ;;  %2027 = vmatpush1.bf16.msra.mxu1 %v2892_v16 }
  0x6c   : > { %2094 = vmatprep.subr.bf16.mxu0 %v2878_v5  ;;  %2142 = vmatprep.subr.bf16.mxu1 %v2878_v5 }
  0x6e   : > { %2673 = vmatmul.mubr.msk.bf16.vlgmr.msra.gmra.mrb[40].mxu0 %vm522_vm0, %v2672_v48  ;;  %2676 = vmatmul.mubr.msk.bf16.vlgmr.msra.gmra.mrb[40].mxu1 %vm522_vm0, %v2675_v49  ;;  %v3186_v48 = vshrl.u32 %v442_v41, 7 }
  0x6f   : > { %2095 = vmatpush1.bf16.msra.mxu0 %v2883_v11  ;;  %2143 = vmatpush1.bf16.msra.mxu1 %v2883_v11 }
  0x70   : > { %2096 = vmatprep.subr.bf16.mxu0 %v2885_v12  ;;  %2144 = vmatprep.subr.bf16.mxu1 %v2885_v12 }
  0x71   : > { %2126 = vmatprep.mubr.bf16.mxu0 %v2775_v1  ;;  %2174 = vmatprep.mubr.bf16.mxu1 %v2775_v1 }
  0x73   : > { %2097 = vmatpush1.bf16.msra.mxu0 %v2892_v16  ;;  %2145 = vmatpush1.bf16.msra.mxu1 %v2892_v16 }
  0x74   : > { %2212 = vmatprep.subr.bf16.mxu0 %v2878_v5  ;;  %2282 = vmatprep.subr.bf16.mxu1 %v2878_v5 }
  0x76   : > { %2679 = vmatmul.mubr.msk.bf16.vlgmr.msra.gmra.mrb[44].mxu0 %vm522_vm0, %v2678_v50  ;;  %2681 = vmatmul.mubr.msk.bf16.vlgmr.msra.gmra.mrb[44].mxu1 %vm522_vm0, %v2680_v51 }
  0x77   : > { %2213 = vmatpush1.bf16.msra.mxu0 %v2883_v11  ;;  %2283 = vmatpush1.bf16.msra.mxu1 %v2883_v11 }
  0x78   : > { %2214 = vmatprep.subr.bf16.mxu0 %v2885_v12  ;;  %2284 = vmatprep.subr.bf16.mxu1 %v2885_v12 }
  0x79   : > { %2244 = vmatprep.mubr.bf16.mxu0 %v2775_v1  ;;  %2314 = vmatprep.mubr.bf16.mxu1 %v2775_v1 }
  0x7b   : > { %2215 = vmatpush1.bf16.msra.mxu0 %v2892_v16  ;;  %2285 = vmatpush1.bf16.msra.mxu1 %v2892_v16 }
  0x7c   : > { %2352 = vmatprep.subr.bf16.mxu0 %v2878_v5 }
  0x7e   : > { %2684 = vmatmul.mubr.msk.bf16.vlgmr.msra.gmra.mrb[48].mxu0 %vm522_vm0, %v2683_v52  ;;  %2687 = vmatmul.mubr.msk.bf16.vlgmr.msra.gmra.mrb[48].mxu1 %vm522_vm0, %v2686_v53  ;;  %v3189_v53 = vsub.s32 0, %v3186_v48 }
  0x7f   : > { %2353 = vmatpush1.bf16.msra.mxu0 %v2883_v11  ;;  %2384 = vmatprep.mubr.bf16.mxu0 %v2775_v1 }
  0x80   : > { %2354 = vmatprep.subr.bf16.mxu0 %v2885_v12 }
  0x83   : > { %2355 = vmatpush1.bf16.msra.mxu0 %v2892_v16 }
  0x86   : > { %2690 = vmatmul.mubr.msk.bf16.vlgmr.msra.gmra.mrb[52].mxu0 %vm522_vm0, %v2689_v54 }
  0xa3   : > { %v371_v56 = vpop.xlane.xlu0 %370 }
  0xa4   : > { %v381_v58 = vmul.f32 0.00390625, %v371_v56  ;;  %v359_v59 = vpop.xlane.xlu1 %358  ;;  %v2604_v56 = vld [vmem:[%s3503_s4 + $0x40] sm:$0xff] }
  0xa5   : > { %v389_v61 = vmul.f32 %v385_v57, %v359_v59  ;;  %v2606_v59 = vld [vmem:[%s3503_s4 + $0x50] sm:$0xff] }
  0xa6   : > { %v415_v60 = vmul.f32 %v2599_v55, %v381_v58  ;;  %v2605_v55 = vld [vmem:[%s3503_s4 + $0x48] sm:$0xff]  ;;  %v2607_v58 = vld [vmem:[%s3503_s4 + $0x58] sm:$0xff] }
  0xa7   : > { %v374_v0 = vpop.xlane.xlu0 %373  ;;  %v394_v5 = vsel %vm393_vm1, %v389_v61, 0.0 }
  0xa8   : > { %v382_v1 = vmul.f32 0.00390625, %v374_v0  ;;  %v362_v2 = vpop.xlane.xlu1 %361  ;;  %v419_v4 = vsel %vm393_vm1, %v415_v60, 0.0 }
  0xa9   : > { %v390_v3 = vmul.f32 %v386_v62, %v362_v2 }
  0xaa   : > { %v416_v6 = vmul.f32 %v2600_v63, %v382_v1 }
  0xab   : > { %v395_v7 = vsel %vm393_vm1, %v390_v3, 0.0  ;;  %v377_v9 = vpop.xlane.xlu0 %376 }
  0xac   : > { %v420_v11 = vsel %vm393_vm1, %v416_v6, 0.0  ;;  %v383_v12 = vmul.f32 0.00390625, %v377_v9  ;;  %v396_v14 = vadd.f32 %v395_v7, %v394_v5 }
  0xad   : > { %v421_v13 = vadd.f32 %v420_v11, %v419_v4  ;;  %v365_v15 = vpop.xlane.xlu1 %364 }
  0xae   : > { %v417_v16 = vmul.f32 %v2601_v8, %v383_v12  ;;  %v391_v17 = vmul.f32 %v387_v10, %v365_v15 }
  0xaf   : > { %v380_v19 = vpop.xlane.xlu0 %379 }
  0xb0   : > { %v422_v21 = vsel %vm393_vm1, %v417_v16, 0.0  ;;  %v397_v22 = vsel %vm393_vm1, %v391_v17, 0.0  ;;  %v384_v23 = vmul.f32 0.00390625, %v380_v19 }
  0xb1   : > { %v423_v24 = vadd.f32 %v422_v21, %v421_v13  ;;  %v398_v25 = vadd.f32 %v397_v22, %v396_v14  ;;  %v368_v26 = vpop.xlane.xlu1 %367 }
  0xb2   : > { %v418_v27 = vmul.f32 %v2602_v18, %v384_v23  ;;  %v392_v28 = vmul.f32 %v388_v20, %v368_v26 }
  0xb4   : > { %v424_v29 = vsel %vm393_vm1, %v418_v27, 0.0  ;;  %v399_v30 = vsel %vm393_vm1, %v392_v28, 0.0 }
  0xb5   : > { %v425_v31 = vadd.f32 %v424_v29, %v423_v24  ;;  %v400_v32 = vadd.f32 %v399_v30, %v398_v25 }
  0xb7   : > { %v426_v33 = vrot.slane %v425_v31, 4  ;;  %v401_v34 = vrot.slane %v400_v32, 4 }
  0xb9   : > { %v427_v35 = vadd.f32 %v426_v33, %v425_v31  ;;  %v402_v36 = vadd.f32 %v401_v34, %v400_v32 }
  0xbb   : > { %v428_v37 = vrot.slane %v427_v35, 2  ;;  %v403_v38 = vrot.slane %v402_v36, 2 }
  0xbd   : > { %v429_v39 = vadd.f32 %v428_v37, %v427_v35  ;;  %v404_v40 = vadd.f32 %v403_v38, %v402_v36 }
  0xbf   : > { %v430_v42 = vrot.slane %v429_v39, 1  ;;  %v405_v43 = vrot.slane %v404_v40, 1 }
  0xc1   : > { %v431_v46 = vadd.f32 %v430_v42, %v429_v39  ;;  %v406_v47 = vadd.f32 %v405_v43, %v404_v40 }
  0xc3   : > { %v434_v49 = vadd.f32 %v2603_v44, %v431_v46  ;;  %v408_v50 = vadd.f32 %v407_v45, %v406_v47 }
  0xc5   : > { %v435_v51 = vmax.f32 %v434_v49, 0.0  ;;  %v409_v52 = vmax.f32 %v408_v50, 0.0 }
  0xc7   : > { %v436_v54 = vadd.f32 %v435_v51, %v409_v52 }
  0xc9   : > { %v445_v57 = vrot.slane %v436_v54, %v3189_v53 }
  0xcb   : > { %v447_v60 = vmul.f32 %v2605_v55, %v445_v57  ;;  %v446_v61 = vmul.f32 %v2604_v56, %v445_v57  ;;  %v449_v0 = vmul.f32 %v2607_v58, %v445_v57  ;;  %v448_v1 = vmul.f32 %v2606_v59, %v445_v57 }
  0xcd   : > { %v453_v62 = vsel %vm393_vm1, %v447_v60, 0.0  ;;  %v450_v63 = vsel %vm393_vm1, %v446_v61, 0.0  ;;  %v459_v2 = vsel %vm393_vm1, %v449_v0, 0.0  ;;  %v456_v3 = vsel %vm393_vm1, %v448_v1, 0.0 }
  0xce   : > { %454 = vadd.xlane.f32.xlu1 %v453_v62  ;;  %451 = vadd.xlane.f32.xlu0 %v450_v63 }
  0xd2   : > { %460 = vadd.xlane.f32.xlu1 %v459_v2  ;;  %457 = vadd.xlane.f32.xlu0 %v456_v3 }
  0xf0   : > { %v560_v4 = vpop.f32.mrb[0].mxu0 }
  0xf1   : > { %v631_v5 = vpop.f32.mrb[0].mxu1  ;;  %v562_v6 = vpop.f32.mrb[1].mxu0  ;;  %567 = vrot.lane.b32.xlu1 %v560_v4, %s2776_s18 }
  0xf2   : > { %v633_v7 = vpop.f32.mrb[1].mxu1  ;;  %v564_v8 = vpop.f32.mrb[2].mxu0 }
  0xf3   : > { %v635_v9 = vpop.f32.mrb[2].mxu1  ;;  %v565_v10 = vpop.f32.mrb[3].mxu0 }
  0xf4   : > { %v636_v11 = vpop.f32.mrb[3].mxu1 }
  0xf5   : > { %638 = vrot.lane.b32.xlu1 %v631_v5, %s2777_s19 }
  0xf9   : > { %v701_v12 = vpop.f32.mrb[4].mxu0  ;;  %v771_v13 = vpop.f32.mrb[4].mxu1  ;;  %569 = vrot.lane.b32.xlu1 %v562_v6, %s2776_s18  ;;  %s2794_s18 = smov 45  }
  0xfa   : > { %v703_v14 = vpop.f32.mrb[5].mxu0  ;;  %v773_v15 = vpop.f32.mrb[5].mxu1 }
  0xfb   : > { %v705_v16 = vpop.f32.mrb[6].mxu0  ;;  %v775_v17 = vpop.f32.mrb[6].mxu1  ;;  %710 = vrot.lane.b32.xlu0 %v703_v14, %s2778_s20 }
  0xfc   : > { %v706_v18 = vpop.f32.mrb[7].mxu0  ;;  %v776_v19 = vpop.f32.mrb[7].mxu1 }
  0xfd   : > { %640 = vrot.lane.b32.xlu1 %v633_v7, %s2777_s19  ;;  %s2795_s19 = smov 3  }
  0xff   : > { %780 = vrot.lane.b32.xlu0 %v773_v15, %s2779_s21 }
 0x101   : > { %v3208_v20 = vpop.f32.mrb[8].mxu0  ;;  %v889_v21 = vpop.f32.mrb[8].mxu1  ;;  %708 = vrot.lane.b32.xlu1 %v701_v12, %s2778_s20  ;;  %s2796_s20 = smov 125  }
 0x102   : > { %v3210_v22 = vpop.f32.mrb[9].mxu0  ;;  %v891_v23 = vpop.f32.mrb[9].mxu1 }
 0x103   : > { %v845_v24 = vpop.f32.mrb[10].mxu0  ;;  %v893_v25 = vpop.f32.mrb[10].mxu1  ;;  %898 = vrot.lane.b32.xlu0 %v891_v23, %s2780_s22 }
 0x104   : > { %v846_v26 = vpop.f32.mrb[11].mxu0  ;;  %v894_v27 = vpop.f32.mrb[11].mxu1 }
 0x105   : > { %778 = vrot.lane.b32.xlu1 %v771_v13, %s2779_s21  ;;  %v3216_v25 = vpop.permute.xlu1 %517  ;;  %s2797_s21 = smov 80  }
 0x109   : > { %v959_v28 = vpop.f32.mrb[12].mxu0  ;;  %v1029_v29 = vpop.f32.mrb[12].mxu1  ;;  %896 = vrot.lane.b32.xlu1 %v889_v21, %s2780_s22  ;;  %s2798_s22 = smov 83  }
 0x10a   : > { %v961_v30 = vpop.f32.mrb[13].mxu0  ;;  %v1031_v31 = vpop.f32.mrb[13].mxu1 }
 0x10b   : > { %v963_v32 = vpop.f32.mrb[14].mxu0  ;;  %v1033_v33 = vpop.f32.mrb[14].mxu1  ;;  %968 = vrot.lane.b32.xlu0 %v961_v30, %s2781_s23 }
 0x10c   : > { %v964_v34 = vpop.f32.mrb[15].mxu0  ;;  %v1034_v35 = vpop.f32.mrb[15].mxu1 }
 0x10d   : > { %966 = vrot.lane.b32.xlu1 %v959_v28, %s2781_s23  ;;  %v3218_v34 = vpop.permute.xlu1 %1162 }
 0x10f   : > { %1038 = vrot.lane.b32.xlu0 %v1031_v31, %s2782_s24 }
 0x111   : > { %v1099_v36 = vpop.f32.mrb[16].mxu0  ;;  %v1205_v37 = vpop.f32.mrb[16].mxu1  ;;  %1036 = vrot.lane.b32.xlu1 %v1029_v29, %s2782_s24 }
 0x112   : > { %v1101_v38 = vpop.f32.mrb[17].mxu0  ;;  %v1207_v39 = vpop.f32.mrb[17].mxu1 }
 0x113   : > { %v1103_v40 = vpop.f32.mrb[18].mxu0  ;;  %v1209_v42 = vpop.f32.mrb[18].mxu1  ;;  %1214 = vrot.lane.b32.xlu0 %v1207_v39, %s2783_s25 }
 0x114   : > { %v1104_v43 = vpop.f32.mrb[19].mxu0  ;;  %v1210_v44 = vpop.f32.mrb[19].mxu1 }
 0x115   : > { %1212 = vrot.lane.b32.xlu1 %v1205_v37, %s2783_s25  ;;  %v3224_v44 = vpop.permute.xlu1 %1805  ;;  %s2799_s25 = smov 77  }
 0x117   : > { %1108 = vrot.lane.b32.xlu0 %v1101_v38, %s2784_s26 }
 0x119   : > { %v1275_v45 = vpop.f32.mrb[20].mxu0  ;;  %v1345_v46 = vpop.f32.mrb[20].mxu1  ;;  %1106 = vrot.lane.b32.xlu1 %v1099_v36, %s2784_s26 }
 0x11a   : > { %v1277_v47 = vpop.f32.mrb[21].mxu0  ;;  %v1347_v49 = vpop.f32.mrb[21].mxu1 }
 0x11b   : > { %v1279_v50 = vpop.f32.mrb[22].mxu0  ;;  %v1349_v51 = vpop.f32.mrb[22].mxu1  ;;  %1284 = vrot.lane.b32.xlu0 %v1277_v47, %s2785_s27 }
 0x11c   : > { %v1280_v52 = vpop.f32.mrb[23].mxu0  ;;  %v1350_v54 = vpop.f32.mrb[23].mxu1 }
 0x11d   : > { %1282 = vrot.lane.b32.xlu1 %v1275_v45, %s2785_s27  ;;  %v3226_v45 = vpop.permute.xlu0 %506 }
 0x11f   : > { %1354 = vrot.lane.b32.xlu0 %v1347_v49, %s2786_s28 }
 0x121   : > { %v1415_v55 = vpop.f32.mrb[24].mxu0  ;;  %v3212_v56 = vpop.f32.mrb[24].mxu1  ;;  %1352 = vrot.lane.b32.xlu1 %v1345_v46, %s2786_s28 }
 0x122   : > { %v1417_v57 = vpop.f32.mrb[25].mxu0  ;;  %v3214_v58 = vpop.f32.mrb[25].mxu1 }
 0x123   : > { %v1419_v59 = vpop.f32.mrb[26].mxu0  ;;  %v1489_v60 = vpop.f32.mrb[26].mxu1  ;;  %1424 = vrot.lane.b32.xlu0 %v1417_v57, %s2787_s29 }
 0x124   : > { %v1420_v61 = vpop.f32.mrb[27].mxu0  ;;  %v1490_v62 = vpop.f32.mrb[27].mxu1 }
 0x125   : > { %1422 = vrot.lane.b32.xlu1 %v1415_v55, %s2787_s29  ;;  %v3228_v57 = vpop.permute.xlu0 %1780  ;;  %v3230_v59 = vpop.permute.xlu1 %1136  ;;  %v462_v61 = vld [vmem:[%s3505_s6] sm:$0xff] }
 0x129   : > { %v1533_v63 = vpop.f32.mrb[28].mxu0  ;;  %v1603_v0 = vpop.f32.mrb[28].mxu1 }
 0x12a   : > { %v1535_v1 = vpop.f32.mrb[29].mxu0  ;;  %v1605_v2 = vpop.f32.mrb[29].mxu1  ;;  %1540 = vrot.lane.b32.xlu1 %v1533_v63, %s2788_s30  ;;  %v463_v63 = vld [vmem:[%s3505_s6 + $0x8] sm:$0xff] }
 0x12b   : > { %v1537_v3 = vpop.f32.mrb[30].mxu0  ;;  %v1607_v4 = vpop.f32.mrb[30].mxu1  ;;  %1542 = vrot.lane.b32.xlu0 %v1535_v1, %s2788_s30 }
 0x12c   : > { %v1538_v5 = vpop.f32.mrb[31].mxu0  ;;  %v1608_v6 = vpop.f32.mrb[31].mxu1 }
 0x12e   : > { %1610 = vrot.lane.b32.xlu1 %v1603_v0, %s2789_s10 }
 0x12f   : > { %1612 = vrot.lane.b32.xlu0 %v1605_v2, %s2789_s10  ;;  %v2692_v2 = vld [vmem:[%s3502_s3 + $0x14] sm:$0xf] }
 0x131   : > { %v1673_v7 = vpop.f32.mrb[32].mxu0  ;;  %v1743_v8 = vpop.f32.mrb[32].mxu1 }
 0x132   : > { %v1675_v9 = vpop.f32.mrb[33].mxu0  ;;  %v1745_v10 = vpop.f32.mrb[33].mxu1 }
 0x133   : > { %v1677_v11 = vpop.f32.mrb[34].mxu0  ;;  %v1747_v12 = vpop.f32.mrb[34].mxu1  ;;  %1682 = vrot.lane.b32.xlu1 %v1675_v9, %s2790_s13  ;;  %1680 = vrot.lane.b32.xlu0 %v1673_v7, %s2790_s13  ;;  %v464_v7 = vld [vmem:[%s3505_s6 + $0x10] sm:$0xff]  ;;  %v465_v9 = vld [vmem:[%s3505_s6 + $0x18] sm:$0xff] }
 0x134   : > { %v1678_v13 = vpop.f32.mrb[35].mxu0  ;;  %v1748_v14 = vpop.f32.mrb[35].mxu1 }
 0x137   : > { %1752 = vrot.lane.b32.xlu1 %v1745_v10, %s2791_s14  ;;  %1750 = vrot.lane.b32.xlu0 %v1743_v8, %s2791_s14 }
 0x139   : > { %v1848_v15 = vpop.f32.mrb[36].mxu0  ;;  %v1918_v16 = vpop.f32.mrb[36].mxu1 }
 0x13a   : > { %v1850_v17 = vpop.f32.mrb[37].mxu0  ;;  %v1920_v18 = vpop.f32.mrb[37].mxu1 }
 0x13b   : > { %v1852_v19 = vpop.f32.mrb[38].mxu0  ;;  %v1922_v21 = vpop.f32.mrb[38].mxu1  ;;  %1855 = vrot.lane.b32.xlu1 %v1848_v15, %s2792_s16  ;;  %1857 = vrot.lane.b32.xlu0 %v1850_v17, %s2792_s16  ;;  %s342_s16 = scalar_lea.vmem %s3507_s8, %s2697_s7 }
 0x13c   : > { %v1853_v23 = vpop.f32.mrb[39].mxu0  ;;  %v1923_v24 = vpop.f32.mrb[39].mxu1  ;;  %v3251_v19 = vsub.s32 1, %v3186_v48  ;;  %v576_v21 = vld [vmem:[%s3500_s1] ss:$8 sm:$0x3] }
 0x13f   : > { %1925 = vrot.lane.b32.xlu1 %v1918_v16, %s2793_s17  ;;  %1927 = vrot.lane.b32.xlu0 %v1920_v18, %s2793_s17  ;;  %v3248_v18 = vand.u32 127, %v442_v41  ;;  %v2615_v41 = vld [vmem:[%s3500_s1 + $0x1] ss:$8 sm:$0x3] }
 0x141   : > { %v1988_v26 = vpop.f32.mrb[40].mxu0  ;;  %v2058_v27 = vpop.f32.mrb[40].mxu1  ;;  %vm573_vm2 = vcmp.lt.s32.totalorder %v3248_v18, 17  ;;  %vm642_vm3 = vcmp.lt.s32.totalorder %v3248_v18, 16  ;;  %vm712_vm4 = vcmp.lt.s32.totalorder %v3248_v18, 15  ;;  %vm782_vm6 = vcmp.lt.s32.totalorder %v3248_v18, 1 }
 0x142   : > { %v1990_v28 = vpop.f32.mrb[41].mxu0  ;;  %v2060_v29 = vpop.f32.mrb[41].mxu1  ;;  %vm900_vm7 = vcmp.lt.s32.totalorder %v3248_v18, 127  ;;  %vm970_vm8 = vcmp.lt.s32.totalorder %v3248_v18, 113  ;;  %vm1040_vm9 = vcmp.lt.s32.totalorder %v3248_v18, 112  ;;  %vm1110_vm10 = vcmp.lt.s32.totalorder %v3248_v18, 111 }
 0x143   : > { %v1992_v30 = vpop.f32.mrb[42].mxu0  ;;  %v2062_v31 = vpop.f32.mrb[42].mxu1  ;;  %1995 = vrot.lane.b32.xlu1 %v1988_v26, %s2794_s18  ;;  %1997 = vrot.lane.b32.xlu0 %v1990_v28, %s2794_s18  ;;  %v581_v26 = vrot.slane %v576_v21, %v3189_v53  ;;  %vm1216_vm11 = vcmp.lt.s32.totalorder %v3248_v18, 34  ;;  %vm1286_vm13 = vcmp.lt.s32.totalorder %v3248_v18, 32  ;;  %vm1356_vm14 = vcmp.lt.s32.totalorder %v3248_v18, 30 }
 0x144   : > { %v1993_v32 = vpop.f32.mrb[43].mxu0  ;;  %v2063_v33 = vpop.f32.mrb[43].mxu1  ;;  %vm1426_vm15 = vcmp.lt.s32.totalorder %v3248_v18, 2  ;;  %vm1544_vm0 = vcmp.lt.s32.totalorder %v3248_v18, 126  ;;  %vm1614_vm1 = vcmp.lt.s32.totalorder %v3248_v18, 98 }
 0x147   : > { %2065 = vrot.lane.b32.xlu1 %v2058_v27, %s2795_s19  ;;  %2067 = vrot.lane.b32.xlu0 %v2060_v29, %s2795_s19  ;;  %v585_v27 = vrot.slane %v576_v21, %v3251_v19 }
 0x149   : > { %v3220_v35 = vpop.f32.mrb[44].mxu0  ;;  %v2176_v36 = vpop.f32.mrb[44].mxu1 }
 0x14a   : > { %v3222_v37 = vpop.f32.mrb[45].mxu0  ;;  %v2178_v38 = vpop.f32.mrb[45].mxu1 }
 0x14b   : > { %v2132_v39 = vpop.f32.mrb[46].mxu0  ;;  %v2180_v40 = vpop.f32.mrb[46].mxu1  ;;  %2183 = vrot.lane.b32.xlu1 %v2176_v36, %s2796_s20  ;;  %2185 = vrot.lane.b32.xlu0 %v2178_v38, %s2796_s20  ;;  %v651_v36 = vrot.slane %v2615_v41, %v3189_v53  ;;  %v2618_v38 = vld [vmem:[%s3500_s1 + $0x2] ss:$8 sm:$0x3] }
 0x14c   : > { %v2133_v42 = vpop.f32.mrb[47].mxu0  ;;  %v2181_v43 = vpop.f32.mrb[47].mxu1 }
 0x14d   : > { %v655_v43 = vrot.slane %v2615_v41, %v3251_v19  ;;  %v2629_v41 = vld [vmem:[%s3500_s1 + $0x6] ss:$8 sm:$0x3] }
 0x151   : > { %v2246_v46 = vpop.f32.mrb[48].mxu0  ;;  %v2316_v47 = vpop.f32.mrb[48].mxu1 }
 0x152   : > { %v2248_v49 = vpop.f32.mrb[49].mxu0  ;;  %v2318_v50 = vpop.f32.mrb[49].mxu1  ;;  %2323 = vrot.lane.b32.xlu1 %v2316_v47, %s2797_s21  ;;  %2253 = vrot.lane.b32.xlu0 %v2246_v46, %s2798_s22 }
 0x153   : > { %v2250_v51 = vpop.f32.mrb[50].mxu0  ;;  %v2320_v52 = vpop.f32.mrb[50].mxu1 }
 0x154   : > { %v2251_v54 = vpop.f32.mrb[51].mxu0  ;;  %v2321_v55 = vpop.f32.mrb[51].mxu1  ;;  %v721_v51 = vrot.slane %v2618_v38, %v3189_v53  ;;  %v725_v52 = vrot.slane %v2618_v38, %v3251_v19  ;;  %v979_v38 = vrot.slane %v2629_v41, %v3189_v53 }
 0x156   : > { %2255 = vrot.lane.b32.xlu1 %v2248_v49, %s2798_s22  ;;  %2325 = vrot.lane.b32.xlu0 %v2318_v50, %s2797_s21  ;;  %s2699_s22 = sshll.u32 %s3510_s12, 5 }
 0x157   : > { %s3284_s27 = scalar_lea.vmem %s3508_s9, %s2699_s22 }
 0x159   : > { %v2386_v60 = vpop.f32.mrb[52].mxu0 }
 0x15a   : > { %v2388_v62 = vpop.f32.mrb[53].mxu0  ;;  %2393 = vrot.lane.b32.xlu1 %v2386_v60, %s2799_s25 }
 0x15b   : > { %v2390_v0 = vpop.f32.mrb[54].mxu0  ;;  %2395 = vrot.lane.b32.xlu0 %v2388_v62, %s2799_s25  ;;  %v452_v1 = vpop.xlane.xlu0 %451 }
 0x15c   : > { %v466_v3 = vadd.f32 %v462_v61, %v452_v1  ;;  %v455_v4 = vpop.xlane.xlu1 %454  ;;  %v2391_v5 = vpop.f32.mrb[55].mxu0  ;;  %v2621_v1 = vld [vmem:[%s3500_s1 + $0x3] ss:$8 sm:$0x3] }
 0x15d   : > { %v467_v6 = vadd.f32 %v463_v63, %v455_v4 }
 0x15e   : > { %v2608_v8 = vmul.f32 -1.442695, %v466_v3  ;;  %2423 = vperm.xlu1 %2734, %v2692_v2  }
 0x15f   : > { %v2609_v10 = vmul.f32 -1.442695, %v467_v6  ;;  %v458_v11 = vpop.xlane.xlu0 %457 }
 0x160   : > { %2735 = vpow2.f32 %v2608_v8  ;;  %v468_v12 = vadd.f32 %v464_v7, %v458_v11  ;;  %v461_v13 = vpop.xlane.xlu1 %460  ;;  %v791_v8 = vrot.slane %v2621_v1, %v3189_v53  ;;  %v2626_v11 = vld [vmem:[%s3500_s1 + $0x5] ss:$8 sm:$0x3] }
 0x161   : > { %2737 = vpow2.f32 %v2609_v10  ;;  %v469_v14 = vadd.f32 %v465_v9, %v461_v13  ;;  %v795_v9 = vrot.slane %v2621_v1, %v3251_v19 }
 0x162   : > { %v2610_v15 = vmul.f32 -1.442695, %v468_v12 }
 0x163   : > { %v2611_v16 = vmul.f32 -1.442695, %v469_v14 }
 0x164   : > { %2739 = vpow2.f32 %v2610_v15  ;;  %v568_v17 = vpop.permute.xlu1 %567 }
 0x165   : > { %2741 = vpow2.f32 %v2611_v16 }
 0x168   : > { %v639_v23 = vpop.permute.xlu1 %638 }
 0x16a   : > { %v2736_v24 = vpop.eup %2735 }
 0x16b   : > { %v2738_v28 = vpop.eup %2737  ;;  %v482_v29 = vadd.f32 1.0, %v2736_v24 }
 0x16c   : > { %v483_v48 = vadd.f32 1.0, %v2738_v28  ;;  %v570_v30 = vpop.permute.xlu1 %569 }
 0x16d   : > { %2743 = vrcp.f32 %v482_v29  ;;  %v574_v31 = vsel %vm573_vm2, %v568_v17, %v570_v30  ;;  %v575_v32 = vsel %vm573_vm2, %v570_v30, %v568_v17  ;;  %v711_v33 = vpop.permute.xlu0 %710  ;;  %vm1684_vm2 = vcmp.lt.s32.totalorder %v3248_v18, 96 }
 0x16e   : > { %v2740_v39 = vpop.eup %2739  ;;  %2745 = vrcp.f32 %v483_v48  ;;  %v588_v40 = vmul.f32 %v581_v26, %v575_v32  ;;  %v589_v42 = vmul.f32 %v585_v27, %v574_v31  ;;  %v909_v26 = vrot.slane %v2626_v11, %v3189_v53 }
 0x16f   : > { %v2742_v46 = vpop.eup %2741  ;;  %v484_v47 = vadd.f32 1.0, %v2740_v39  ;;  %v913_v27 = vrot.slane %v2626_v11, %v3251_v19  ;;  %v983_v39 = vrot.slane %v2629_v41, %v3251_v19 }
 0x170   : > { %v485_v49 = vadd.f32 1.0, %v2742_v46  ;;  %v641_v50 = vpop.permute.xlu1 %640  ;;  %v590_v54 = vadd.f32 %v588_v40, %v3216_v25  ;;  %v591_v61 = vadd.f32 %v589_v42, %v3216_v25 }
 0x171   : > { %2747 = vrcp.f32 %v484_v47  ;;  %v643_v55 = vsel %vm642_vm3, %v639_v23, %v641_v50  ;;  %v644_v60 = vsel %vm642_vm3, %v641_v50, %v639_v23  ;;  %v781_v0 = vpop.permute.xlu0 %780  ;;  %vm1754_vm3 = vcmp.lt.s32.totalorder %v3248_v18, 94 }
 0x172   : > { %2749 = vrcp.f32 %v485_v49  ;;  %v658_v62 = vmul.f32 %v651_v36, %v644_v60  ;;  %v659_v63 = vmul.f32 %v655_v43, %v643_v55 }
 0x174   : > { %v660_v2 = vadd.f32 %v658_v62, %v590_v54  ;;  %v661_v3 = vadd.f32 %v659_v63, %v591_v61  ;;  %v709_v4 = vpop.permute.xlu1 %708 }
 0x175   : > { %v713_v25 = vsel %vm712_vm4, %v709_v4, %v711_v33  ;;  %v714_v5 = vsel %vm712_vm4, %v711_v33, %v709_v4  ;;  %v899_v16 = vpop.permute.xlu0 %898  ;;  %v2635_v4 = vld [vmem:[%s3500_s1 + $0x10] ss:$8 sm:$0x3]  ;;  %vm1859_vm4 = vcmp.lt.s32.totalorder %v3248_v18, 51 }
 0x176   : > { %v728_v6 = vmul.f32 %v721_v51, %v714_v5  ;;  %v729_v7 = vmul.f32 %v725_v52, %v713_v25 }
 0x177   : > { %v2744_v10 = vpop.eup %2743 }
 0x178   : > { %v2746_v12 = vpop.eup %2745  ;;  %495 = vst.msk [vmem:[%s3284_s27] sm:$0xff] %vm494_vm5, %v2744_v10  ;;  %v730_v13 = vadd.f32 %v728_v6, %v660_v2  ;;  %v731_v14 = vadd.f32 %v729_v7, %v661_v3  ;;  %2458 = vperm.xlu0 %2733, %v2744_v10   ;;  %v779_v15 = vpop.permute.xlu1 %778  ;;  %v2640_v10 = vld [vmem:[%s3500_s1 + $0x11] ss:$8 sm:$0x3] }
 0x179   : > { %496 = vst.msk [vmem:[%s3284_s27 + $0x8] sm:$0xff] %vm494_vm5, %v2746_v12  ;;  %2463 = vperm.xlu1 %2734, %v2746_v12   ;;  %v783_v17 = vsel %vm782_vm6, %v779_v15, %v781_v0  ;;  %v784_v21 = vsel %vm782_vm6, %v781_v0, %v779_v15  ;;  %vm1999_vm6 = vcmp.lt.s32.totalorder %v3248_v18, 45 }
 0x17a   : > { %v798_v23 = vmul.f32 %v791_v8, %v784_v21  ;;  %v799_v24 = vmul.f32 %v795_v9, %v783_v17  ;;  %v1119_v8 = vrot.slane %v2635_v4, %v3189_v53  ;;  %v1123_v9 = vrot.slane %v2635_v4, %v3251_v19 }
 0x17b   : > { %v2748_v28 = vpop.eup %2747 }
 0x17c   : > { %v2750_v29 = vpop.eup %2749  ;;  %497 = vst.msk [vmem:[%s3284_s27 + $0x10] sm:$0xff] %vm494_vm5, %v2748_v28  ;;  %v800_v48 = vadd.f32 %v798_v23, %v730_v13  ;;  %v801_v30 = vadd.f32 %v799_v24, %v731_v14  ;;  %2468 = vperm.xlu0 %2733, %v2748_v28   ;;  %v897_v31 = vpop.permute.xlu1 %896  ;;  %v2643_v23 = vld [vmem:[%s3500_s1 + $0x12] ss:$8 sm:$0x3]  ;;  %v1225_v24 = vrot.slane %v2640_v10, %v3189_v53 }
 0x17d   : > { %498 = vst.msk [vmem:[%s3284_s27 + $0x18] sm:$0xff] %vm494_vm5, %v2750_v29  ;;  %2473 = vperm.xlu1 %2734, %v2750_v29   ;;  %v901_v32 = vsel %vm900_vm7, %v897_v31, %v899_v16  ;;  %v902_v33 = vsel %vm900_vm7, %v899_v16, %v897_v31  ;;  %v969_v36 = vpop.permute.xlu0 %968  ;;  %v1295_v31 = vrot.slane %v2643_v23, %v3189_v53  ;;  %vm1929_vm5 = vcmp.lt.s32.totalorder %v3248_v18, 48 }
 0x17e   : > { %v848_v40 = vadd.f32 %v3208_v20, %v800_v48  ;;  %v849_v42 = vadd.f32 %v3210_v22, %v801_v30  ;;  %v916_v43 = vmul.f32 %v909_v26, %v901_v32  ;;  %v917_v46 = vmul.f32 %v913_v27, %v902_v33  ;;  %v2632_v20 = vld [vmem:[%s3500_s1 + $0x7] ss:$8 sm:$0x3]  ;;  %v2646_v27 = vld [vmem:[%s3500_s1 + $0x13] ss:$8 sm:$0x3] }
 0x17f   : > { %v1049_v0 = vrot.slane %v2632_v20, %v3189_v53  ;;  %v1053_v1 = vrot.slane %v2632_v20, %v3251_v19  ;;  %v1229_v26 = vrot.slane %v2640_v10, %v3251_v19  ;;  %v1299_v32 = vrot.slane %v2643_v23, %v3251_v19  ;;  %v2657_v23 = vld [vmem:[%s3500_s1 + $0x17] ss:$8 sm:$0x3] }
 0x180   : > { %v918_v47 = vadd.f32 %v916_v43, %v848_v40  ;;  %v919_v49 = vadd.f32 %v917_v46, %v849_v42  ;;  %v967_v50 = vpop.permute.xlu1 %966  ;;  %v2649_v40 = vld [vmem:[%s3500_s1 + $0x14] ss:$8 sm:$0x3]  ;;  %v1369_v46 = vrot.slane %v2646_v27, %v3251_v19  ;;  %vm2069_vm7 = vcmp.lt.s32.totalorder %v3248_v18, 3 }
 0x181   : > { %v971_v51 = vsel %vm970_vm8, %v967_v50, %v969_v36  ;;  %v972_v52 = vsel %vm970_vm8, %v969_v36, %v967_v50  ;;  %v1039_v54 = vpop.permute.xlu0 %1038  ;;  %v1439_v20 = vrot.slane %v2649_v40, %v3251_v19  ;;  %vm2187_vm8 = vcmp.lt.s32.totalorder %v3248_v18, 125 }
 0x182   : > { %v986_v55 = vmul.f32 %v979_v38, %v971_v51  ;;  %v987_v60 = vmul.f32 %v983_v39, %v972_v52  ;;  %v1365_v39 = vrot.slane %v2646_v27, %v3189_v53 }
 0x184   : > { %v988_v61 = vadd.f32 %v986_v55, %v918_v47  ;;  %v989_v22 = vadd.f32 %v987_v60, %v919_v49  ;;  %v1037_v62 = vpop.permute.xlu1 %1036  ;;  %v1435_v60 = vrot.slane %v2649_v40, %v3189_v53  ;;  %v1627_v40 = vrot.slane %v2657_v23, %v3251_v19 }
 0x185   : > { %v1215_v63 = vpop.permute.xlu0 %1214  ;;  %v1041_v2 = vsel %vm1040_vm9, %v1037_v62, %v1039_v54  ;;  %v1042_v3 = vsel %vm1040_vm9, %v1039_v54, %v1037_v62  ;;  %vm2257_vm9 = vcmp.lt.s32.totalorder %v3248_v18, 83 }
 0x186   : > { %v1056_v6 = vmul.f32 %v1049_v0, %v1041_v2  ;;  %v1057_v7 = vmul.f32 %v1053_v1, %v1042_v3 }
 0x188   : > { %v1213_v25 = vpop.permute.xlu1 %1212  ;;  %v1058_v15 = vadd.f32 %v1056_v6, %v988_v61  ;;  %v1059_v16 = vadd.f32 %v1057_v7, %v989_v22 }
 0x189   : > { %v1109_v5 = vpop.permute.xlu0 %1108  ;;  %v1217_v48 = vsel %vm1216_vm11, %v1213_v25, %v1215_v63  ;;  %v1218_v30 = vsel %vm1216_vm11, %v1215_v63, %v1213_v25  ;;  %vm2397_vm11 = vcmp.lt.s32.totalorder %v3248_v18, 77 }
 0x18a   : > { %v1232_v47 = vmul.f32 %v1225_v24, %v1218_v30  ;;  %v1233_v49 = vmul.f32 %v1229_v26, %v1217_v48  ;;  %v512_v24 = vrot.slane %v3226_v45, %v3189_v53  ;;  %v1623_v45 = vrot.slane %v2657_v23, %v3189_v53 }
 0x18c   : > { %v1107_v11 = vpop.permute.xlu1 %1106  ;;  %v1234_v2 = vadd.f32 %v1232_v47, %v3218_v34  ;;  %v1235_v3 = vadd.f32 %v1233_v49, %v3218_v34  ;;  %v2654_v34 = vld [vmem:[%s3500_s1 + $0x16] ss:$8 sm:$0x3] }
 0x18d   : > { %v1111_v12 = vsel %vm1110_vm10, %v1107_v11, %v1109_v5  ;;  %v1112_v13 = vsel %vm1110_vm10, %v1109_v5, %v1107_v11  ;;  %v1285_v14 = vpop.permute.xlu0 %1284  ;;  %v1553_v48 = vrot.slane %v2654_v34, %v3189_v53  ;;  %v1557_v30 = vrot.slane %v2654_v34, %v3251_v19 }
 0x18e   : > { %v1126_v17 = vmul.f32 %v1119_v8, %v1111_v12  ;;  %v1127_v21 = vmul.f32 %v1123_v9, %v1112_v13  ;;  %vm2327_vm10 = vcmp.lt.s32.totalorder %v3248_v18, 80 }
 0x190   : > { %v1128_v41 = vadd.f32 %v1126_v17, %v1058_v15  ;;  %v1129_v28 = vadd.f32 %v1127_v21, %v1059_v16  ;;  %v1283_v29 = vpop.permute.xlu1 %1282 }
 0x191   : > { %v1355_v38 = vpop.permute.xlu0 %1354  ;;  %v1287_v42 = vsel %vm1286_vm13, %v1283_v29, %v1285_v14  ;;  %v1288_v43 = vsel %vm1286_vm13, %v1285_v14, %v1283_v29 }
 0x192   : > { %v1130_v33 = vmax.f32 %v1128_v41, 0.0  ;;  %v1131_v36 = vmax.f32 %v1129_v28, 0.0  ;;  %v1302_v62 = vmul.f32 %v1295_v31, %v1288_v43  ;;  %v1303_v63 = vmul.f32 %v1299_v32, %v1287_v42  ;;  %v2660_v31 = vld [vmem:[%s3500_s1 + $0x20] ss:$8 sm:$0x3] }
 0x193   : > { %v1693_v47 = vrot.slane %v2660_v31, %v3189_v53  ;;  %v1697_v49 = vrot.slane %v2660_v31, %v3251_v19 }
 0x194   : > { %v1139_v50 = vmul.f32 %v3230_v59, %v1130_v33  ;;  %v1140_v51 = vmul.f32 %v3230_v59, %v1131_v36  ;;  %v1353_v52 = vpop.permute.xlu1 %1352  ;;  %v1304_v10 = vadd.f32 %v1302_v62, %v1234_v2  ;;  %v1305_v11 = vadd.f32 %v1303_v63, %v1235_v3 }
 0x195   : > { %v1357_v54 = vsel %vm1356_vm14, %v1353_v52, %v1355_v38  ;;  %v1358_v55 = vsel %vm1356_vm14, %v1355_v38, %v1353_v52  ;;  %v1425_v25 = vpop.permute.xlu0 %1424 }
 0x196   : > { %v1142_v61 = vsel %vm1141_vm12, %v1139_v50, 0.0  ;;  %v1149_v22 = vsel %vm1141_vm12, %v1140_v51, 0.0  ;;  %v1372_v59 = vmul.f32 %v1365_v39, %v1358_v55  ;;  %v1373_v4 = vmul.f32 %v1369_v46, %v1357_v54 }
 0x197   : > { %v1143_v0 = vrot.slane %v1142_v61, 4  ;;  %v1150_v1 = vrot.slane %v1149_v22, 4 }
 0x198   : > { %v1423_v5 = vpop.permute.xlu1 %1422  ;;  %v1374_v16 = vadd.f32 %v1372_v59, %v1304_v10  ;;  %v1375_v17 = vadd.f32 %v1373_v4, %v1305_v11 }
 0x199   : > { %v1144_v6 = vadd.f32 %v1143_v0, %v1142_v61  ;;  %v1151_v7 = vadd.f32 %v1150_v1, %v1149_v22  ;;  %v1427_v8 = vsel %vm1426_vm15, %v1423_v5, %v1425_v25  ;;  %v1428_v9 = vsel %vm1426_vm15, %v1425_v25, %v1423_v5 }
 0x19a   : > { %v1442_v12 = vmul.f32 %v1435_v60, %v1428_v9  ;;  %v1443_v13 = vmul.f32 %v1439_v20, %v1427_v8  ;;  %v2663_v20 = vld [vmem:[%s3500_s1 + $0x21] ss:$8 sm:$0x3] }
 0x19b   : > { %v1145_v14 = vrot.slane %v1144_v6, 2  ;;  %v1152_v15 = vrot.slane %v1151_v7, 2  ;;  %v1763_v2 = vrot.slane %v2663_v20, %v3189_v53  ;;  %v1767_v3 = vrot.slane %v2663_v20, %v3251_v19  ;;  %v2677_v20 = vld [vmem:[%s3500_s1 + $0x25] ss:$8 sm:$0x3] }
 0x19c   : > { %v1541_v21 = vpop.permute.xlu1 %1540  ;;  %v1444_v28 = vadd.f32 %v1442_v12, %v1374_v16  ;;  %v1445_v29 = vadd.f32 %v1443_v13, %v1375_v17 }
 0x19d   : > { %v1146_v26 = vadd.f32 %v1145_v14, %v1144_v6  ;;  %v1153_v27 = vadd.f32 %v1152_v15, %v1151_v7  ;;  %v1543_v41 = vpop.permute.xlu0 %1542 }
 0x19e   : > { %v1545_v36 = vsel %vm1544_vm0, %v1541_v21, %v1543_v41  ;;  %v1546_v38 = vsel %vm1544_vm0, %v1543_v41, %v1541_v21  ;;  %v1492_v50 = vadd.f32 %v3212_v56, %v1444_v28  ;;  %v1493_v51 = vadd.f32 %v3214_v58, %v1445_v29 }
 0x19f   : > { %v1147_v32 = vrot.slane %v1146_v26, 1  ;;  %v1154_v33 = vrot.slane %v1153_v27, 1  ;;  %v1560_v55 = vmul.f32 %v1553_v48, %v1545_v36  ;;  %v1561_v60 = vmul.f32 %v1557_v30, %v1546_v38 }
 0x1a0   : > { %v1611_v39 = vpop.permute.xlu1 %1610 }
 0x1a1   : > { %v1148_v42 = vadd.f32 %v1147_v32, %v1146_v26  ;;  %v1155_v43 = vadd.f32 %v1154_v33, %v1153_v27  ;;  %v1613_v46 = vpop.permute.xlu0 %1612  ;;  %v1562_v59 = vadd.f32 %v1560_v55, %v1492_v50  ;;  %v1563_v4 = vadd.f32 %v1561_v60, %v1493_v51  ;;  %v2668_v32 = vld [vmem:[%s3500_s1 + $0x22] ss:$8 sm:$0x3] }
 0x1a2   : > { %v1615_v52 = vsel %vm1614_vm1, %v1611_v39, %v1613_v46  ;;  %v1616_v54 = vsel %vm1614_vm1, %v1613_v46, %v1611_v39  ;;  %v1868_v39 = vrot.slane %v2668_v32, %v3189_v53 }
 0x1a3   : > { %v3402_v61 = vadd.f32 %v1148_v42, %v512_v24  ;;  %v3404_v22 = vadd.f32 %v1155_v43, %v512_v24  ;;  %v1630_v62 = vmul.f32 %v1623_v45, %v1615_v52  ;;  %v1631_v63 = vmul.f32 %v1627_v40, %v1616_v54  ;;  %v2674_v42 = vld [vmem:[%s3500_s1 + $0x24] ss:$8 sm:$0x3] }
 0x1a4   : > { %v1872_v40 = vrot.slane %v2668_v32, %v3251_v19  ;;  %v2008_v55 = vrot.slane %v2674_v42, %v3189_v53 }
 0x1a5   : > { %v1681_v0 = vpop.permute.xlu0 %1680  ;;  %v1683_v1 = vpop.permute.xlu1 %1682  ;;  %v1632_v6 = vadd.f32 %v1630_v62, %v1562_v59  ;;  %v1633_v7 = vadd.f32 %v1631_v63, %v1563_v4 }
 0x1a6   : > { %v1685_v56 = vsel %vm1684_vm2, %v1681_v0, %v1683_v1  ;;  %v1686_v58 = vsel %vm1684_vm2, %v1683_v1, %v1681_v0 }
 0x1a7   : > { %v1700_v25 = vmul.f32 %v1693_v47, %v1685_v56  ;;  %v1701_v5 = vmul.f32 %v1697_v49, %v1686_v58 }
 0x1a9   : > { %v1751_v8 = vpop.permute.xlu0 %1750  ;;  %v1753_v9 = vpop.permute.xlu1 %1752  ;;  %v1702_v12 = vadd.f32 %v1700_v25, %v1632_v6  ;;  %v1703_v13 = vadd.f32 %v1701_v5, %v1633_v7  ;;  %v2078_v25 = vrot.slane %v2677_v20, %v3189_v53  ;;  %v2082_v5 = vrot.slane %v2677_v20, %v3251_v19 }
 0x1aa   : > { %v1755_v10 = vsel %vm1754_vm3, %v1751_v8, %v1753_v9  ;;  %v1756_v11 = vsel %vm1754_vm3, %v1753_v9, %v1751_v8 }
 0x1ab   : > { %v1770_v14 = vmul.f32 %v1763_v2, %v1755_v10  ;;  %v1771_v15 = vmul.f32 %v1767_v3, %v1756_v11  ;;  %v2012_v3 = vrot.slane %v2674_v42, %v3251_v19 }
 0x1ad   : > { %v1772_v34 = vadd.f32 %v1770_v14, %v1702_v12  ;;  %v1773_v16 = vadd.f32 %v1771_v15, %v1703_v13  ;;  %v1858_v17 = vpop.permute.xlu0 %1857  ;;  %v1856_v21 = vpop.permute.xlu1 %1855 }
 0x1ae   : > { %v1860_v47 = vsel %vm1859_vm4, %v1856_v21, %v1858_v17  ;;  %v1861_v49 = vsel %vm1859_vm4, %v1858_v17, %v1856_v21 }
 0x1af   : > { %v1774_v23 = vmax.f32 %v1772_v34, 0.0  ;;  %v1775_v24 = vmax.f32 %v1773_v16, 0.0  ;;  %v1875_v63 = vmul.f32 %v1868_v39, %v1861_v49  ;;  %v1876_v0 = vmul.f32 %v1872_v40, %v1860_v47 }
 0x1b1   : > { %v1783_v26 = vmul.f32 %v3228_v57, %v1774_v23  ;;  %v1784_v27 = vmul.f32 %v3228_v57, %v1775_v24  ;;  %v1928_v41 = vpop.permute.xlu0 %1927  ;;  %v1926_v28 = vpop.permute.xlu1 %1925  ;;  %v2671_v57 = vld [vmem:[%s3500_s1 + $0x23] ss:$8 sm:$0x3]  ;;  %v1877_v10 = vadd.f32 %v1875_v63, %v3224_v44  ;;  %v1878_v11 = vadd.f32 %v1876_v0, %v3224_v44  ;;  %v2682_v44 = vld [vmem:[%s3500_s1 + $0x27] ss:$8 sm:$0x3] }
 0x1b2   : > { %v1938_v50 = vrot.slane %v2671_v57, %v3189_v53  ;;  %v1942_v51 = vrot.slane %v2671_v57, %v3251_v19  ;;  %v1930_v1 = vsel %vm1929_vm5, %v1926_v28, %v1928_v41  ;;  %v1931_v56 = vsel %vm1929_vm5, %v1928_v41, %v1926_v28 }
 0x1b3   : > { %v1785_v29 = vsel %vm1141_vm12, %v1783_v26, 0.0  ;;  %v1792_v48 = vsel %vm1141_vm12, %v1784_v27, 0.0  ;;  %v2200_v32 = vrot.slane %v2682_v44, %v3251_v19 }
 0x1b4   : > { %v1786_v30 = vrot.slane %v1785_v29, 4  ;;  %v1793_v31 = vrot.slane %v1792_v48, 4  ;;  %v1945_v8 = vmul.f32 %v1938_v50, %v1931_v56  ;;  %v1946_v9 = vmul.f32 %v1942_v51, %v1930_v1  ;;  %v2688_v50 = vld [vmem:[%s3500_s1 + $0x31] ss:$8 sm:$0x3] }
 0x1b5   : > { %v1998_v33 = vpop.permute.xlu0 %1997  ;;  %v1996_v45 = vpop.permute.xlu1 %1995 }
 0x1b6   : > { %v1787_v36 = vadd.f32 %v1786_v30, %v1785_v29  ;;  %v1794_v38 = vadd.f32 %v1793_v31, %v1792_v48  ;;  %v2000_v59 = vsel %vm1999_vm6, %v1996_v45, %v1998_v33  ;;  %v2001_v4 = vsel %vm1999_vm6, %v1998_v33, %v1996_v45 }
 0x1b7   : > { %v2015_v14 = vmul.f32 %v2008_v55, %v2001_v4  ;;  %v2016_v15 = vmul.f32 %v2012_v3, %v2000_v59  ;;  %v1947_v23 = vadd.f32 %v1945_v8, %v1877_v10  ;;  %v1948_v24 = vadd.f32 %v1946_v9, %v1878_v11  ;;  %v2691_v55 = vld [vmem:[%s3500_s1 + $0x32] ss:$8 sm:$0x3] }
 0x1b8   : > { %v1788_v43 = vrot.slane %v1787_v36, 2  ;;  %v1795_v46 = vrot.slane %v1794_v38, 2 }
 0x1b9   : > { %v2068_v60 = vpop.permute.xlu0 %2067  ;;  %v2066_v62 = vpop.permute.xlu1 %2065  ;;  %v2017_v41 = vadd.f32 %v2015_v14, %v1947_v23  ;;  %v2018_v28 = vadd.f32 %v2016_v15, %v1948_v24 }
 0x1ba   : > { %v1789_v52 = vadd.f32 %v1788_v43, %v1787_v36  ;;  %v1796_v54 = vadd.f32 %v1795_v46, %v1794_v38  ;;  %v2070_v12 = vsel %vm2069_vm7, %v2066_v62, %v2068_v60  ;;  %v2071_v13 = vsel %vm2069_vm7, %v2068_v60, %v2066_v62 }
 0x1bb   : > { %v2085_v26 = vmul.f32 %v2078_v25, %v2071_v13  ;;  %v2086_v27 = vmul.f32 %v2082_v5, %v2070_v12 }
 0x1bc   : > { %v1790_v58 = vrot.slane %v1789_v52, 1  ;;  %v1797_v2 = vrot.slane %v1796_v54, 1 }
 0x1bd   : > { %v2186_v34 = vpop.permute.xlu0 %2185  ;;  %v2184_v16 = vpop.permute.xlu1 %2183  ;;  %v2087_v30 = vadd.f32 %v2085_v26, %v2017_v41  ;;  %v2088_v31 = vadd.f32 %v2086_v27, %v2018_v28 }
 0x1be   : > { %v1791_v6 = vadd.f32 %v1790_v58, %v1789_v52  ;;  %v1798_v7 = vadd.f32 %v1797_v2, %v1796_v54  ;;  %v2188_v33 = vsel %vm2187_vm8, %v2184_v16, %v2186_v34  ;;  %v2189_v45 = vsel %vm2187_vm8, %v2186_v34, %v2184_v16 }
 0x1bf   : > { %v2135_v43 = vadd.f32 %v3220_v35, %v2087_v30  ;;  %v2136_v46 = vadd.f32 %v3222_v37, %v2088_v31  ;;  %v2204_v49 = vmul.f32 %v2200_v32, %v2189_v45  ;;  %v2336_v54 = vrot.slane %v2688_v50, %v3189_v53 }
 0x1c0   : > { %v3448_v17 = vadd.f32 %v1791_v6, %v3402_v61  ;;  %v3451_v21 = vadd.f32 %v1798_v7, %v3404_v22  ;;  %v2196_v61 = vrot.slane %v2682_v44, %v3189_v53  ;;  %v2685_v22 = vld [vmem:[%s3500_s1 + $0x30] ss:$8 sm:$0x3]  ;;  %v2340_v37 = vrot.slane %v2688_v50, %v3251_v19 }
 0x1c1   : > { %v2266_v38 = vrot.slane %v2685_v22, %v3189_v53  ;;  %v2270_v57 = vrot.slane %v2685_v22, %v3251_v19  ;;  %v2206_v35 = vadd.f32 %v2204_v49, %v2136_v46  ;;  %v2406_v58 = vrot.slane %v2691_v55, %v3189_v53 }
 0x1c2   : > { %v2203_v47 = vmul.f32 %v2196_v61, %v2188_v33  ;;  %v2410_v2 = vrot.slane %v2691_v55, %v3251_v19 }
 0x1c4   : > { %v2254_v29 = vpop.permute.xlu0 %2253  ;;  %v2324_v48 = vpop.permute.xlu1 %2323  ;;  %v2205_v60 = vadd.f32 %v2203_v47, %v2135_v43 }
 0x1c8   : > { %v2326_v36 = vpop.permute.xlu0 %2325  ;;  %v2256_v39 = vpop.permute.xlu1 %2255 }
 0x1c9   : > { %v2258_v40 = vsel %vm2257_vm9, %v2254_v29, %v2256_v39  ;;  %v2259_v42 = vsel %vm2257_vm9, %v2256_v39, %v2254_v29  ;;  %v2328_v63 = vsel %vm2327_vm10, %v2324_v48, %v2326_v36  ;;  %v2329_v0 = vsel %vm2327_vm10, %v2326_v36, %v2324_v48 }
 0x1ca   : > { %v2273_v51 = vmul.f32 %v2266_v38, %v2258_v40  ;;  %v2274_v52 = vmul.f32 %v2270_v57, %v2259_v42  ;;  %v2343_v4 = vmul.f32 %v2336_v54, %v2328_v63  ;;  %v2344_v25 = vmul.f32 %v2340_v37, %v2329_v0  ;;  %v2759_v54 = vld [vmem:[%s2873_s15] sm:$0xff]  ;;  %v2763_v0 = vld [vmem:[%s2873_s15 + $0x8] sm:$0xff] }
 0x1cb   : > { %v2761_v37 = vld [vmem:[%s2873_s15 + $0x20] sm:$0xff] }
 0x1cc   : > { %v2394_v62 = vpop.permute.xlu1 %2393  ;;  %v2275_v1 = vadd.f32 %v2273_v51, %v2205_v60  ;;  %v2276_v56 = vadd.f32 %v2274_v52, %v2206_v35  ;;  %v2760_v60 = vld [vmem:[%s2873_s15 + $0x10] sm:$0xff] }
 0x1cd   : > { %v2396_v20 = vpop.permute.xlu0 %2395 }
 0x1ce   : > { %v2398_v3 = vsel %vm2397_vm11, %v2394_v62, %v2396_v20  ;;  %v2399_v59 = vsel %vm2397_vm11, %v2396_v20, %v2394_v62  ;;  %v2345_v7 = vadd.f32 %v2343_v4, %v2275_v1  ;;  %v2346_v8 = vadd.f32 %v2344_v25, %v2276_v56  ;;  %v2762_v62 = vld [vmem:[%s2873_s15 + $0x30] sm:$0xff]  ;;  %v2764_v56 = vld [vmem:[%s2873_s15 + $0x18] sm:$0xff] }
 0x1cf   : > { %v2413_v5 = vmul.f32 %v2406_v58, %v2398_v3  ;;  %v2414_v6 = vmul.f32 %v2410_v2, %v2399_v59  ;;  %v2765_v2 = vld [vmem:[%s2873_s15 + $0x28] sm:$0xff]  ;;  %v2766_v59 = vld [vmem:[%s2873_s15 + $0x38] sm:$0xff] }
 0x1d1   : > { %v2415_v9 = vadd.f32 %v2413_v5, %v2345_v7  ;;  %v2416_v10 = vadd.f32 %v2414_v6, %v2346_v8 }
 0x1d3   : > { %v2417_v18 = vmax.f32 %v2415_v9, 0.0  ;;  %v2418_v11 = vmax.f32 %v2416_v10, 0.0 }
 0x1dd   : > { %v2424_v12 = vpop.permute.xlu1 %2423 }
 0x1de   : > { %v2426_v13 = vmul.f32 %v2424_v12, %v2417_v18  ;;  %v2427_v14 = vmul.f32 %v2424_v12, %v2418_v11 }
 0x1e0   : > { %v2428_v15 = vsel %vm1141_vm12, %v2426_v13, 0.0  ;;  %v2435_v53 = vsel %vm1141_vm12, %v2427_v14, 0.0 }
 0x1e1   : > { %v2429_v19 = vrot.slane %v2428_v15, 4  ;;  %v2436_v34 = vrot.slane %v2435_v53, 4 }
 0x1e3   : > { %v2430_v16 = vadd.f32 %v2429_v19, %v2428_v15  ;;  %v2437_v23 = vadd.f32 %v2436_v34, %v2435_v53 }
 0x1e5   : > { %v2431_v24 = vrot.slane %v2430_v16, 2  ;;  %v2438_v26 = vrot.slane %v2437_v23, 2 }
 0x1e7   : > { %v2432_v27 = vadd.f32 %v2431_v24, %v2430_v16  ;;  %v2439_v44 = vadd.f32 %v2438_v26, %v2437_v23 }
 0x1e9   : > { %v2433_v41 = vrot.slane %v2432_v27, 1  ;;  %v2440_v28 = vrot.slane %v2439_v44, 1 }
 0x1eb   : > { %v2434_v29 = vadd.f32 %v2433_v41, %v2432_v27  ;;  %v2441_v48 = vadd.f32 %v2440_v28, %v2439_v44 }
 0x1ed   : > { %v2442_v61 = vadd.f32 %v2434_v29, %v3448_v17  ;;  %v2443_v22 = vadd.f32 %v2441_v48, %v3451_v21 }
 0x1ef   : > { %v2693_v30 = vmul.f32 -1.442695, %v2442_v61  ;;  %v2694_v31 = vmul.f32 -1.442695, %v2443_v22 }
 0x1f1   : > { %2751 = vpow2.f32 %v2693_v30 }
 0x1f2   : > { %2753 = vpow2.f32 %v2694_v31 }
 0x1f7   : > { %v2459_v38 = vpop.permute.xlu0 %2458 }
 0x1f8   : > { %v2464_v57 = vpop.permute.xlu1 %2463 }
 0x1fb   : > { %v2752_v32 = vpop.eup %2751  ;;  %v2469_v40 = vpop.permute.xlu0 %2468 }
 0x1fc   : > { %v2754_v33 = vpop.eup %2753  ;;  %v2450_v45 = vadd.f32 1.0, %v2752_v32  ;;  %v2474_v17 = vpop.permute.xlu1 %2473 }
 0x1fd   : > { %v2451_v36 = vadd.f32 1.0, %v2754_v33 }
 0x1fe   : > { %2755 = vrcp.f32 %v2450_v45 }
 0x1ff   : > { %2757 = vrcp.f32 %v2451_v36 }
 0x208   : > { %v2756_v39 = vpop.eup %2755 }
 0x209   : > { %v2758_v21 = vpop.eup %2757  ;;  %v2476_v42 = vmul.f32 %v2756_v39, %v2459_v38  ;;  %v2478_v43 = vmul.f32 %v2756_v39, %v2464_v57  ;;  %v2480_v46 = vmul.f32 %v2756_v39, %v2469_v40  ;;  %v2482_v47 = vmul.f32 %v2756_v39, %v2474_v17 }
 0x20a   : > { %v2477_v49 = vmul.f32 %v2758_v21, %v2459_v38  ;;  %v2479_v50 = vmul.f32 %v2758_v21, %v2464_v57  ;;  %v2481_v51 = vmul.f32 %v2758_v21, %v2469_v40  ;;  %v2483_v52 = vmul.f32 %v2758_v21, %v2474_v17 }
 0x20b   : > { %v2484_v55 = vmul.f32 %v2759_v54, %v2476_v42  ;;  %v2486_v35 = vmul.f32 %v2760_v60, %v2478_v43  ;;  %v2488_v20 = vmul.f32 %v2761_v37, %v2480_v46  ;;  %v2490_v63 = vmul.f32 %v2762_v62, %v2482_v47 }
 0x20c   : > { %v2485_v1 = vmul.f32 %v2763_v0, %v2477_v49  ;;  %v2487_v58 = vmul.f32 %v2764_v56, %v2479_v50  ;;  %v2489_v3 = vmul.f32 %v2765_v2, %v2481_v51  ;;  %v2491_v4 = vmul.f32 %v2766_v59, %v2483_v52 }
 0x20d   : > { %2492 = vst [vmem:[%s342_s16] sm:$0xff] %v2484_v55  ;;  %2494 = vst [vmem:[%s342_s16 + $0x10] sm:$0xff] %v2486_v35 }
 0x20e   : > { %2496 = vst [vmem:[%s342_s16 + $0x20] sm:$0xff] %v2488_v20  ;;  %2498 = vst [vmem:[%s342_s16 + $0x30] sm:$0xff] %v2490_v63 }
 0x20f   : > { %2493 = vst [vmem:[%s342_s16 + $0x8] sm:$0xff] %v2485_v1  ;;  %2495 = vst [vmem:[%s342_s16 + $0x18] sm:$0xff] %v2487_v58 }
 0x210   : > { %2497 = vst [vmem:[%s342_s16 + $0x28] sm:$0xff] %v2489_v3  ;;  %2499 = vst [vmem:[%s342_s16 + $0x38] sm:$0xff] %v2491_v4 }
 0x211 PF: > { %s22_s11 = sadd.s32 1, %s2773_s11  }
 0x212   : > { %p19_p4 = scmp.ge.s32.totalorder %s22_s11, 4  }
 0x214   :  { %21 = sbr.rel (!%p19_p4) target bundleno = 3 (0x3), region = 151 }

</bundles_post_ra>
